<compile_context>
chip_gen: v6e
topology: v6e:2x2x1
jax: 0.10.0
libtpu: 0.0.40
codegen_flags: <defaults>
</compile_context>

<pallas_src>
import functools

import numpy as np
import jax
import jax.numpy as jnp
from jax.experimental import pallas as pl
from jax.experimental.pallas import tpu as pltpu


# ---------------------------------------------------------------------------
# Fused kernel: one batch *tile* (TB elements) per grid step.
#   ph_ref : (4, PH1, PW1, TB*Cin)   stride-2 phase planes, batch in lanes
#   e_ref  : (9, TB*Cin, TB*C1)      conv1 block-diag expansion weights
#   b1_ref : (1, TB*C1)
#   w2_ref : (9, TB*C1, TB*C2)       conv2 block-diag weights
#   b2_ref : (1, TB*C2)
#   g_ref  : (9, M2, M1)             0/1 gather matrices (stride-2 + padding)
#   o_ref  : (M2, TB*C2)             rows = oh2*OW2 + ow2, cols = b*C2 + c2
# ---------------------------------------------------------------------------
def _fused_kernel(ph_ref, e_ref, b1_ref, w2_ref, b2_ref, g_ref, o_ref, *, dims):
    TBCin, TBC1, TBC2, OH1, OW1, OH2, OW2 = dims
    M1 = OH1 * OW1
    M2 = OH2 * OW2

    # ---------------- conv1 + ReLU -> h (M1, TB*C1), stays in VMEM ----------
    acc1 = jnp.broadcast_to(b1_ref[...], (M1, TBC1))
    for kh in range(3):
        for kw in range(3):
            t = kh * 3 + kw
            tap = ph_ref[(kh % 2) * 2 + (kw % 2),
                         kh // 2: kh // 2 + OH1,
                         kw // 2: kw // 2 + OW1, :].reshape(M1, TBCin)
            acc1 = acc1 + jnp.dot(tap, e_ref[t],
                                  preferred_element_type=jnp.float32)
    h = jnp.maximum(acc1, 0.0)                                    # (M1, TB*C1)

    # ---------------- conv2 + ReLU -> out (M2, TB*C2) (MXU) ------------------
    acc2 = jnp.broadcast_to(b2_ref[...], (M2, TBC2))
    for t in range(9):
        # Stride-2 tap gather (incl. zero padding) as a matmul on the MXU.
        tap2 = jnp.dot(g_ref[t], h, preferred_element_type=jnp.float32)   # (M2, TB*C1)
        acc2 = acc2 + jnp.dot(tap2, w2_ref[t],
                              preferred_element_type=jnp.float32)         # (M2, TB*C2)
    o_ref[...] = jnp.maximum(acc2, 0.0).astype(o_ref.dtype)


# ---------------------------------------------------------------------------
# Constant 0/1 gather matrices for conv2: g[t, p*OW2+q, i*OW1+j] = 1 iff tap
# t=(kh,kw) of conv2 output (p,q) reads conv1 output (i,j); rows that fall in
# the zero padding stay all-zero.  Built once at trace time (tiny).
# ---------------------------------------------------------------------------
def _conv2_gather_matrices(OH1, OW1, OH2, OW2):
    M1, M2 = OH1 * OW1, OH2 * OW2
    g = np.zeros((9, M2, M1), np.float32)
    for kh in range(3):
        for kw in range(3):
            t = kh * 3 + kw
            for p in range(OH2):
                for q in range(OW2):
                    i = 2 * p + kh - 1
                    j = 2 * q + kw - 1
                    if 0 <= i < OH1 and 0 <= j < OW1:
                        g[t, p * OW2 + q, i * OW1 + j] = 1.0
    return jnp.asarray(g)


# ---------------------------------------------------------------------------
# Public forward: NCHW in, NCHW out (matches PyTorch).
# ---------------------------------------------------------------------------
def face_loc_encoder_forward(x_nchw, params, *, batch_tile=8):
    N, Cin, H, W = x_nchw.shape
    C1, C2 = params["w1"].shape[0], params["w2"].shape[0]
    OH1, OW1 = (H + 1) // 2, (W + 1) // 2
    OH2, OW2 = (OH1 + 1) // 2, (OW1 + 1) // 2
    PH1, PW1 = OH1 + 1, OW1 + 1
    M1, M2 = OH1 * OW1, OH2 * OW2

    TB = int(batch_tile)                       # batch elements per grid step
    n_steps = -(-N // TB)                      # ceil
    Np = n_steps * TB

    # --- Cheap XLA-side glue (1x data) --------------------------------------
    # NCHW -> NHWC, pad batch to a multiple of TB, spatial pad, stride-2 phase
    # split, and fold the batch tile into the channel (lane) dimension.
    x = jnp.transpose(x_nchw, (0, 2, 3, 1)).astype(jnp.float32)   # (N,H,W,Cin)
    if Np > N:
        x = jnp.pad(x, ((0, Np - N), (0, 0), (0, 0), (0, 0)))
    xp = jnp.pad(x, ((0, 0), (1, 2 * PH1 - H - 1), (1, 2 * PW1 - W - 1), (0, 0)))
    ph = (xp.reshape(Np, PH1, 2, PW1, 2, Cin)
            .transpose(0, 2, 4, 1, 3, 5)
            .reshape(Np, 4, PH1, PW1, Cin))     # ph[n,2u+v,p,q,c] = xp[n,2p+u,2q+v,c]
    ph = (ph.reshape(n_steps, TB, 4, PH1, PW1, Cin)
            .transpose(0, 2, 3, 4, 1, 5)
            .reshape(n_steps, 4, PH1, PW1, TB * Cin))  # lanes: b*Cin + c

    # --- Weights: per-tap block-diagonal matrices (batch-in-lanes) ----------
    w1t = jnp.transpose(params["w1"], (2, 3, 1, 0)).reshape(9, Cin, C1).astype(jnp.float32)
    w2t = jnp.transpose(params["w2"], (2, 3, 1, 0)).reshape(9, C1, C2).astype(jnp.float32)
    eye = jnp.eye(TB, dtype=jnp.float32)
    # E[t]    = kron(I_TB, W1[t]) : (TB*Cin, TB*C1)
    # W2bd[t] = kron(I_TB, W2[t]) : (TB*C1,  TB*C2)
    E = jnp.einsum("bB,tio->tbiBo", eye, w1t).reshape(9, TB * Cin, TB * C1)
    W2bd = jnp.einsum("bB,tio->tbiBo", eye, w2t).reshape(9, TB * C1, TB * C2)
    b1w = jnp.tile(params["b1"].reshape(1, C1).astype(jnp.float32), (1, TB))   # (1, TB*C1)
    b2w = jnp.tile(params["b2"].reshape(1, C2).astype(jnp.float32), (1, TB))   # (1, TB*C2)

    g = _conv2_gather_matrices(OH1, OW1, OH2, OW2)    # (9, M2, M1)

    kernel = functools.partial(
        _fused_kernel,
        dims=(TB * Cin, TB * C1, TB * C2, OH1, OW1, OH2, OW2))

    y_flat = pl.pallas_call(
        kernel,
        out_shape=jax.ShapeDtypeStruct((n_steps, M2, TB * C2), jnp.float32),
        grid=(n_steps,),
        in_specs=[
            pl.BlockSpec((None, 4, PH1, PW1, TB * Cin), lambda s: (s, 0, 0, 0, 0)),
            pl.BlockSpec((9, TB * Cin, TB * C1), lambda s: (0, 0, 0)),  # resident
            pl.BlockSpec((1, TB * C1), lambda s: (0, 0)),
            pl.BlockSpec((9, TB * C1, TB * C2), lambda s: (0, 0, 0)),
            pl.BlockSpec((1, TB * C2), lambda s: (0, 0)),
            pl.BlockSpec((9, M2, M1), lambda s: (0, 0, 0)),
        ],
        out_specs=pl.BlockSpec((None, M2, TB * C2), lambda s: (s, 0, 0)),
        compiler_params=pltpu.CompilerParams(
            dimension_semantics=("parallel",),        # batch tiles across TCs on v7x
            vmem_limit_bytes=32 * 1024 * 1024,
        ),
    )(ph, E, b1w, W2bd, b2w, g)

    # (n_steps, M2, TB*C2) -> (N, C2, OH2, OW2)
    y = (y_flat.reshape(n_steps, OH2, OW2, TB, C2)
               .transpose(0, 3, 1, 2, 4)
               .reshape(Np, OH2, OW2, C2)[:N])
    return jnp.transpose(y, (0, 3, 1, 2))             # NHWC -> NCHW


# ---------------------------------------------------------------------------
# Deterministic parameter init (shapes from the module's __init__).
# ---------------------------------------------------------------------------
def init_params(dim=1, key=None):
    if key is None:
        key = jax.random.PRNGKey(0)
    k1, k2, k3, k4 = jax.random.split(key, 4)
    return {
        "w1": 0.1 * jax.random.normal(k1, (8, dim, 3, 3), jnp.float32),
        "b1": 0.1 * jax.random.normal(k2, (8,), jnp.float32),
        "w2": 0.1 * jax.random.normal(k3, (16, 8, 3, 3), jnp.float32),
        "b2": 0.1 * jax.random.normal(k4, (16,), jnp.float32),
    }


# ---------------------------------------------------------------------------
# Pure-JAX reference (lax conv) for the correctness check.
# ---------------------------------------------------------------------------
def _reference_forward(x_nchw, params):
    def conv(x, w, b):
        y = jax.lax.conv_general_dilated(
            x, w, window_strides=(2, 2), padding=((1, 1), (1, 1)),
            dimension_numbers=("NCHW", "OIHW", "NCHW"))
        return jax.nn.relu(y + b[None, :, None, None])
    h = conv(x_nchw, params["w1"], params["b1"])
    return conv(h, params["w2"], params["b2"])


if __name__ == "__main__":
    key = jax.random.PRNGKey(0)
    params = init_params(dim=1, key=key)

    # Small input consistent with the module: N=2, C=dim=1, H=W=16.
    x = jax.random.normal(jax.random.fold_in(key, 7), (2, 1, 16, 16), jnp.float32)

    fwd = jax.jit(functools.partial(face_loc_encoder_forward, params=params))
    out = fwd(x)
    jax.block_until_ready(out)

    ref = _reference_forward(x, params)
    assert out.shape == (2, 16, 4, 4), out.shape
    err = float(jnp.max(jnp.abs(out - ref)))
    assert err < 1e-4, err

    print("KERNEL_OK")
</pallas_src>

<mosaic_0001>
module attributes {stable_mosaic.version = 11 : i64} {
  func.func @_fused_kernel(%arg0: i32, %arg1: memref<1x4x9x9x8xf32, #tpu.memory_space<vmem>>, %arg2: memref<9x8x64xf32, #tpu.memory_space<vmem>>, %arg3: memref<1x64xf32, #tpu.memory_space<vmem>>, %arg4: memref<9x64x128xf32, #tpu.memory_space<vmem>>, %arg5: memref<1x128xf32, #tpu.memory_space<vmem>>, %arg6: memref<9x16x64xf32, #tpu.memory_space<vmem>>, %arg7: memref<1x16x128xf32, #tpu.memory_space<vmem>>) attributes {dimension_semantics = [#tpu.dimension_semantics<parallel>], iteration_bounds = array<i64: 1>, scalar_prefetch = 0 : i64, scratch_operands = 0 : i64, tpu.core_type = #tpu.core_type<tc>, window_params = [{transform_indices = @transform_0, window_bounds = array<i64: 1, 4, 9, 9, 8>}, {pipeline_mode = #tpu.pipeline_mode<synchronous>, transform_indices = @transform_1, window_bounds = array<i64: 9, 8, 64>}, {pipeline_mode = #tpu.pipeline_mode<synchronous>, transform_indices = @transform_2, window_bounds = array<i64: 1, 64>}, {pipeline_mode = #tpu.pipeline_mode<synchronous>, transform_indices = @transform_3, window_bounds = array<i64: 9, 64, 128>}, {pipeline_mode = #tpu.pipeline_mode<synchronous>, transform_indices = @transform_4, window_bounds = array<i64: 1, 128>}, {pipeline_mode = #tpu.pipeline_mode<synchronous>, transform_indices = @transform_5, window_bounds = array<i64: 9, 16, 64>}, {transform_indices = @transform_6, window_bounds = array<i64: 1, 16, 128>}]} {
    %c0 = arith.constant 0 : index
    %c0_0 = arith.constant 0 : index
    %0 = vector.load %arg3[%c0, %c0_0] : memref<1x64xf32, #tpu.memory_space<vmem>>, vector<1x64xf32>
    %1 = vector.shape_cast %0 : vector<1x64xf32> to vector<1x64xf32>
    %2 = vector.broadcast %1 : vector<1x64xf32> to vector<64x64xf32>
    %c0_1 = arith.constant 0 : index
    %c0_2 = arith.constant 0 : index
    %c0_3 = arith.constant 0 : index
    %c0_4 = arith.constant 0 : index
    %c0_5 = arith.constant 0 : index
    %3 = vector.load %arg1[%c0_1, %c0_2, %c0_3, %c0_4, %c0_5] : memref<1x4x9x9x8xf32, #tpu.memory_space<vmem>>, vector<1x1x8x8x8xf32>
    %4 = vector.shape_cast %3 : vector<1x1x8x8x8xf32> to vector<8x8x8xf32>
    %5 = vector.shape_cast %4 : vector<8x8x8xf32> to vector<64x8xf32>
    %c0_6 = arith.constant 0 : index
    %c0_7 = arith.constant 0 : index
    %c0_8 = arith.constant 0 : index
    %6 = vector.load %arg2[%c0_6, %c0_7, %c0_8] : memref<9x8x64xf32, #tpu.memory_space<vmem>>, vector<1x8x64xf32>
    %7 = vector.shape_cast %6 : vector<1x8x64xf32> to vector<8x64xf32>
    %cst = arith.constant dense<0.000000e+00> : vector<64x64xf32>
    %8 = tpu.matmul %5, %7, %cst {dimension_numbers = #tpu.dot_dimension_numbers<[1], [0], [0], [1], [0, 0, 1, 1], [], []>} : vector<64x8xf32>, vector<8x64xf32>, vector<64x64xf32> -> vector<64x64xf32>
    %9 = arith.addf %2, %8 : vector<64x64xf32>
    %c0_9 = arith.constant 0 : index
    %c1 = arith.constant 1 : index
    %c0_10 = arith.constant 0 : index
    %c0_11 = arith.constant 0 : index
    %c0_12 = arith.constant 0 : index
    %10 = vector.load %arg1[%c0_9, %c1, %c0_10, %c0_11, %c0_12] : memref<1x4x9x9x8xf32, #tpu.memory_space<vmem>>, vector<1x1x8x8x8xf32>
    %11 = vector.shape_cast %10 : vector<1x1x8x8x8xf32> to vector<8x8x8xf32>
    %12 = vector.shape_cast %11 : vector<8x8x8xf32> to vector<64x8xf32>
    %c1_13 = arith.constant 1 : index
    %c0_14 = arith.constant 0 : index
    %c0_15 = arith.constant 0 : index
    %13 = vector.load %arg2[%c1_13, %c0_14, %c0_15] : memref<9x8x64xf32, #tpu.memory_space<vmem>>, vector<1x8x64xf32>
    %14 = vector.shape_cast %13 : vector<1x8x64xf32> to vector<8x64xf32>
    %cst_16 = arith.constant dense<0.000000e+00> : vector<64x64xf32>
    %15 = tpu.matmul %12, %14, %cst_16 {dimension_numbers = #tpu.dot_dimension_numbers<[1], [0], [0], [1], [0, 0, 1, 1], [], []>} : vector<64x8xf32>, vector<8x64xf32>, vector<64x64xf32> -> vector<64x64xf32>
    %16 = arith.addf %9, %15 : vector<64x64xf32>
    %c0_17 = arith.constant 0 : index
    %c0_18 = arith.constant 0 : index
    %c0_19 = arith.constant 0 : index
    %c1_20 = arith.constant 1 : index
    %c0_21 = arith.constant 0 : index
    %17 = vector.load %arg1[%c0_17, %c0_18, %c0_19, %c1_20, %c0_21] : memref<1x4x9x9x8xf32, #tpu.memory_space<vmem>>, vector<1x1x8x8x8xf32>
    %18 = vector.shape_cast %17 : vector<1x1x8x8x8xf32> to vector<8x8x8xf32>
    %19 = vector.shape_cast %18 : vector<8x8x8xf32> to vector<64x8xf32>
    %c2 = arith.constant 2 : index
    %c0_22 = arith.constant 0 : index
    %c0_23 = arith.constant 0 : index
    %20 = vector.load %arg2[%c2, %c0_22, %c0_23] : memref<9x8x64xf32, #tpu.memory_space<vmem>>, vector<1x8x64xf32>
    %21 = vector.shape_cast %20 : vector<1x8x64xf32> to vector<8x64xf32>
    %cst_24 = arith.constant dense<0.000000e+00> : vector<64x64xf32>
    %22 = tpu.matmul %19, %21, %cst_24 {dimension_numbers = #tpu.dot_dimension_numbers<[1], [0], [0], [1], [0, 0, 1, 1], [], []>} : vector<64x8xf32>, vector<8x64xf32>, vector<64x64xf32> -> vector<64x64xf32>
    %23 = arith.addf %16, %22 : vector<64x64xf32>
    %c0_25 = arith.constant 0 : index
    %c2_26 = arith.constant 2 : index
    %c0_27 = arith.constant 0 : index
    %c0_28 = arith.constant 0 : index
    %c0_29 = arith.constant 0 : index
    %24 = vector.load %arg1[%c0_25, %c2_26, %c0_27, %c0_28, %c0_29] : memref<1x4x9x9x8xf32, #tpu.memory_space<vmem>>, vector<1x1x8x8x8xf32>
    %25 = vector.shape_cast %24 : vector<1x1x8x8x8xf32> to vector<8x8x8xf32>
    %26 = vector.shape_cast %25 : vector<8x8x8xf32> to vector<64x8xf32>
    %c3 = arith.constant 3 : index
    %c0_30 = arith.constant 0 : index
    %c0_31 = arith.constant 0 : index
    %27 = vector.load %arg2[%c3, %c0_30, %c0_31] : memref<9x8x64xf32, #tpu.memory_space<vmem>>, vector<1x8x64xf32>
    %28 = vector.shape_cast %27 : vector<1x8x64xf32> to vector<8x64xf32>
    %cst_32 = arith.constant dense<0.000000e+00> : vector<64x64xf32>
    %29 = tpu.matmul %26, %28, %cst_32 {dimension_numbers = #tpu.dot_dimension_numbers<[1], [0], [0], [1], [0, 0, 1, 1], [], []>} : vector<64x8xf32>, vector<8x64xf32>, vector<64x64xf32> -> vector<64x64xf32>
    %30 = arith.addf %23, %29 : vector<64x64xf32>
    %c0_33 = arith.constant 0 : index
    %c3_34 = arith.constant 3 : index
    %c0_35 = arith.constant 0 : index
    %c0_36 = arith.constant 0 : index
    %c0_37 = arith.constant 0 : index
    %31 = vector.load %arg1[%c0_33, %c3_34, %c0_35, %c0_36, %c0_37] : memref<1x4x9x9x8xf32, #tpu.memory_space<vmem>>, vector<1x1x8x8x8xf32>
    %32 = vector.shape_cast %31 : vector<1x1x8x8x8xf32> to vector<8x8x8xf32>
    %33 = vector.shape_cast %32 : vector<8x8x8xf32> to vector<64x8xf32>
    %c4 = arith.constant 4 : index
    %c0_38 = arith.constant 0 : index
    %c0_39 = arith.constant 0 : index
    %34 = vector.load %arg2[%c4, %c0_38, %c0_39] : memref<9x8x64xf32, #tpu.memory_space<vmem>>, vector<1x8x64xf32>
    %35 = vector.shape_cast %34 : vector<1x8x64xf32> to vector<8x64xf32>
    %cst_40 = arith.constant dense<0.000000e+00> : vector<64x64xf32>
    %36 = tpu.matmul %33, %35, %cst_40 {dimension_numbers = #tpu.dot_dimension_numbers<[1], [0], [0], [1], [0, 0, 1, 1], [], []>} : vector<64x8xf32>, vector<8x64xf32>, vector<64x64xf32> -> vector<64x64xf32>
    %37 = arith.addf %30, %36 : vector<64x64xf32>
    %c0_41 = arith.constant 0 : index
    %c2_42 = arith.constant 2 : index
    %c0_43 = arith.constant 0 : index
    %c1_44 = arith.constant 1 : index
    %c0_45 = arith.constant 0 : index
    %38 = vector.load %arg1[%c0_41, %c2_42, %c0_43, %c1_44, %c0_45] : memref<1x4x9x9x8xf32, #tpu.memory_space<vmem>>, vector<1x1x8x8x8xf32>
    %39 = vector.shape_cast %38 : vector<1x1x8x8x8xf32> to vector<8x8x8xf32>
    %40 = vector.shape_cast %39 : vector<8x8x8xf32> to vector<64x8xf32>
    %c5 = arith.constant 5 : index
    %c0_46 = arith.constant 0 : index
    %c0_47 = arith.constant 0 : index
    %41 = vector.load %arg2[%c5, %c0_46, %c0_47] : memref<9x8x64xf32, #tpu.memory_space<vmem>>, vector<1x8x64xf32>
    %42 = vector.shape_cast %41 : vector<1x8x64xf32> to vector<8x64xf32>
    %cst_48 = arith.constant dense<0.000000e+00> : vector<64x64xf32>
    %43 = tpu.matmul %40, %42, %cst_48 {dimension_numbers = #tpu.dot_dimension_numbers<[1], [0], [0], [1], [0, 0, 1, 1], [], []>} : vector<64x8xf32>, vector<8x64xf32>, vector<64x64xf32> -> vector<64x64xf32>
    %44 = arith.addf %37, %43 : vector<64x64xf32>
    %c0_49 = arith.constant 0 : index
    %c0_50 = arith.constant 0 : index
    %c1_51 = arith.constant 1 : index
    %c0_52 = arith.constant 0 : index
    %c0_53 = arith.constant 0 : index
    %45 = vector.load %arg1[%c0_49, %c0_50, %c1_51, %c0_52, %c0_53] : memref<1x4x9x9x8xf32, #tpu.memory_space<vmem>>, vector<1x1x8x8x8xf32>
    %46 = vector.shape_cast %45 : vector<1x1x8x8x8xf32> to vector<8x8x8xf32>
    %47 = vector.shape_cast %46 : vector<8x8x8xf32> to vector<64x8xf32>
    %c6 = arith.constant 6 : index
    %c0_54 = arith.constant 0 : index
    %c0_55 = arith.constant 0 : index
    %48 = vector.load %arg2[%c6, %c0_54, %c0_55] : memref<9x8x64xf32, #tpu.memory_space<vmem>>, vector<1x8x64xf32>
    %49 = vector.shape_cast %48 : vector<1x8x64xf32> to vector<8x64xf32>
    %cst_56 = arith.constant dense<0.000000e+00> : vector<64x64xf32>
    %50 = tpu.matmul %47, %49, %cst_56 {dimension_numbers = #tpu.dot_dimension_numbers<[1], [0], [0], [1], [0, 0, 1, 1], [], []>} : vector<64x8xf32>, vector<8x64xf32>, vector<64x64xf32> -> vector<64x64xf32>
    %51 = arith.addf %44, %50 : vector<64x64xf32>
    %c0_57 = arith.constant 0 : index
    %c1_58 = arith.constant 1 : index
    %c1_59 = arith.constant 1 : index
    %c0_60 = arith.constant 0 : index
    %c0_61 = arith.constant 0 : index
    %52 = vector.load %arg1[%c0_57, %c1_58, %c1_59, %c0_60, %c0_61] : memref<1x4x9x9x8xf32, #tpu.memory_space<vmem>>, vector<1x1x8x8x8xf32>
    %53 = vector.shape_cast %52 : vector<1x1x8x8x8xf32> to vector<8x8x8xf32>
    %54 = vector.shape_cast %53 : vector<8x8x8xf32> to vector<64x8xf32>
    %c7 = arith.constant 7 : index
    %c0_62 = arith.constant 0 : index
    %c0_63 = arith.constant 0 : index
    %55 = vector.load %arg2[%c7, %c0_62, %c0_63] : memref<9x8x64xf32, #tpu.memory_space<vmem>>, vector<1x8x64xf32>
    %56 = vector.shape_cast %55 : vector<1x8x64xf32> to vector<8x64xf32>
    %cst_64 = arith.constant dense<0.000000e+00> : vector<64x64xf32>
    %57 = tpu.matmul %54, %56, %cst_64 {dimension_numbers = #tpu.dot_dimension_numbers<[1], [0], [0], [1], [0, 0, 1, 1], [], []>} : vector<64x8xf32>, vector<8x64xf32>, vector<64x64xf32> -> vector<64x64xf32>
    %58 = arith.addf %51, %57 : vector<64x64xf32>
    %c0_65 = arith.constant 0 : index
    %c0_66 = arith.constant 0 : index
    %c1_67 = arith.constant 1 : index
    %c1_68 = arith.constant 1 : index
    %c0_69 = arith.constant 0 : index
    %59 = vector.load %arg1[%c0_65, %c0_66, %c1_67, %c1_68, %c0_69] : memref<1x4x9x9x8xf32, #tpu.memory_space<vmem>>, vector<1x1x8x8x8xf32>
    %60 = vector.shape_cast %59 : vector<1x1x8x8x8xf32> to vector<8x8x8xf32>
    %61 = vector.shape_cast %60 : vector<8x8x8xf32> to vector<64x8xf32>
    %c8 = arith.constant 8 : index
    %c0_70 = arith.constant 0 : index
    %c0_71 = arith.constant 0 : index
    %62 = vector.load %arg2[%c8, %c0_70, %c0_71] : memref<9x8x64xf32, #tpu.memory_space<vmem>>, vector<1x8x64xf32>
    %63 = vector.shape_cast %62 : vector<1x8x64xf32> to vector<8x64xf32>
    %cst_72 = arith.constant dense<0.000000e+00> : vector<64x64xf32>
    %64 = tpu.matmul %61, %63, %cst_72 {dimension_numbers = #tpu.dot_dimension_numbers<[1], [0], [0], [1], [0, 0, 1, 1], [], []>} : vector<64x8xf32>, vector<8x64xf32>, vector<64x64xf32> -> vector<64x64xf32>
    %65 = arith.addf %58, %64 : vector<64x64xf32>
    %cst_73 = arith.constant 0.000000e+00 : f32
    %66 = vector.broadcast %cst_73 : f32 to vector<64x64xf32>
    %67 = arith.maximumf %65, %66 : vector<64x64xf32>
    %c0_74 = arith.constant 0 : index
    %c0_75 = arith.constant 0 : index
    %68 = vector.load %arg5[%c0_74, %c0_75] : memref<1x128xf32, #tpu.memory_space<vmem>>, vector<1x128xf32>
    %69 = vector.shape_cast %68 : vector<1x128xf32> to vector<1x128xf32>
    %70 = vector.broadcast %69 : vector<1x128xf32> to vector<16x128xf32>
    %c0_76 = arith.constant 0 : index
    %c0_77 = arith.constant 0 : index
    %c0_78 = arith.constant 0 : index
    %71 = vector.load %arg6[%c0_76, %c0_77, %c0_78] : memref<9x16x64xf32, #tpu.memory_space<vmem>>, vector<1x16x64xf32>
    %72 = vector.shape_cast %71 : vector<1x16x64xf32> to vector<16x64xf32>
    %cst_79 = arith.constant dense<0.000000e+00> : vector<16x64xf32>
    %73 = tpu.matmul %72, %67, %cst_79 {dimension_numbers = #tpu.dot_dimension_numbers<[1], [0], [0], [1], [0, 0, 1, 1], [], []>} : vector<16x64xf32>, vector<64x64xf32>, vector<16x64xf32> -> vector<16x64xf32>
    %c0_80 = arith.constant 0 : index
    %c0_81 = arith.constant 0 : index
    %c0_82 = arith.constant 0 : index
    %74 = vector.load %arg4[%c0_80, %c0_81, %c0_82] : memref<9x64x128xf32, #tpu.memory_space<vmem>>, vector<1x64x128xf32>
    %75 = vector.shape_cast %74 : vector<1x64x128xf32> to vector<64x128xf32>
    %cst_83 = arith.constant dense<0.000000e+00> : vector<16x128xf32>
    %76 = tpu.matmul %73, %75, %cst_83 {dimension_numbers = #tpu.dot_dimension_numbers<[1], [0], [0], [1], [0, 0, 1, 1], [], []>} : vector<16x64xf32>, vector<64x128xf32>, vector<16x128xf32> -> vector<16x128xf32>
    %77 = arith.addf %70, %76 : vector<16x128xf32>
    %c1_84 = arith.constant 1 : index
    %c0_85 = arith.constant 0 : index
    %c0_86 = arith.constant 0 : index
    %78 = vector.load %arg6[%c1_84, %c0_85, %c0_86] : memref<9x16x64xf32, #tpu.memory_space<vmem>>, vector<1x16x64xf32>
    %79 = vector.shape_cast %78 : vector<1x16x64xf32> to vector<16x64xf32>
    %cst_87 = arith.constant dense<0.000000e+00> : vector<16x64xf32>
    %80 = tpu.matmul %79, %67, %cst_87 {dimension_numbers = #tpu.dot_dimension_numbers<[1], [0], [0], [1], [0, 0, 1, 1], [], []>} : vector<16x64xf32>, vector<64x64xf32>, vector<16x64xf32> -> vector<16x64xf32>
    %c1_88 = arith.constant 1 : index
    %c0_89 = arith.constant 0 : index
    %c0_90 = arith.constant 0 : index
    %81 = vector.load %arg4[%c1_88, %c0_89, %c0_90] : memref<9x64x128xf32, #tpu.memory_space<vmem>>, vector<1x64x128xf32>
    %82 = vector.shape_cast %81 : vector<1x64x128xf32> to vector<64x128xf32>
    %cst_91 = arith.constant dense<0.000000e+00> : vector<16x128xf32>
    %83 = tpu.matmul %80, %82, %cst_91 {dimension_numbers = #tpu.dot_dimension_numbers<[1], [0], [0], [1], [0, 0, 1, 1], [], []>} : vector<16x64xf32>, vector<64x128xf32>, vector<16x128xf32> -> vector<16x128xf32>
    %84 = arith.addf %77, %83 : vector<16x128xf32>
    %c2_92 = arith.constant 2 : index
    %c0_93 = arith.constant 0 : index
    %c0_94 = arith.constant 0 : index
    %85 = vector.load %arg6[%c2_92, %c0_93, %c0_94] : memref<9x16x64xf32, #tpu.memory_space<vmem>>, vector<1x16x64xf32>
    %86 = vector.shape_cast %85 : vector<1x16x64xf32> to vector<16x64xf32>
    %cst_95 = arith.constant dense<0.000000e+00> : vector<16x64xf32>
    %87 = tpu.matmul %86, %67, %cst_95 {dimension_numbers = #tpu.dot_dimension_numbers<[1], [0], [0], [1], [0, 0, 1, 1], [], []>} : vector<16x64xf32>, vector<64x64xf32>, vector<16x64xf32> -> vector<16x64xf32>
    %c2_96 = arith.constant 2 : index
    %c0_97 = arith.constant 0 : index
    %c0_98 = arith.constant 0 : index
    %88 = vector.load %arg4[%c2_96, %c0_97, %c0_98] : memref<9x64x128xf32, #tpu.memory_space<vmem>>, vector<1x64x128xf32>
    %89 = vector.shape_cast %88 : vector<1x64x128xf32> to vector<64x128xf32>
    %cst_99 = arith.constant dense<0.000000e+00> : vector<16x128xf32>
    %90 = tpu.matmul %87, %89, %cst_99 {dimension_numbers = #tpu.dot_dimension_numbers<[1], [0], [0], [1], [0, 0, 1, 1], [], []>} : vector<16x64xf32>, vector<64x128xf32>, vector<16x128xf32> -> vector<16x128xf32>
    %91 = arith.addf %84, %90 : vector<16x128xf32>
    %c3_100 = arith.constant 3 : index
    %c0_101 = arith.constant 0 : index
    %c0_102 = arith.constant 0 : index
    %92 = vector.load %arg6[%c3_100, %c0_101, %c0_102] : memref<9x16x64xf32, #tpu.memory_space<vmem>>, vector<1x16x64xf32>
    %93 = vector.shape_cast %92 : vector<1x16x64xf32> to vector<16x64xf32>
    %cst_103 = arith.constant dense<0.000000e+00> : vector<16x64xf32>
    %94 = tpu.matmul %93, %67, %cst_103 {dimension_numbers = #tpu.dot_dimension_numbers<[1], [0], [0], [1], [0, 0, 1, 1], [], []>} : vector<16x64xf32>, vector<64x64xf32>, vector<16x64xf32> -> vector<16x64xf32>
    %c3_104 = arith.constant 3 : index
    %c0_105 = arith.constant 0 : index
    %c0_106 = arith.constant 0 : index
    %95 = vector.load %arg4[%c3_104, %c0_105, %c0_106] : memref<9x64x128xf32, #tpu.memory_space<vmem>>, vector<1x64x128xf32>
    %96 = vector.shape_cast %95 : vector<1x64x128xf32> to vector<64x128xf32>
    %cst_107 = arith.constant dense<0.000000e+00> : vector<16x128xf32>
    %97 = tpu.matmul %94, %96, %cst_107 {dimension_numbers = #tpu.dot_dimension_numbers<[1], [0], [0], [1], [0, 0, 1, 1], [], []>} : vector<16x64xf32>, vector<64x128xf32>, vector<16x128xf32> -> vector<16x128xf32>
    %98 = arith.addf %91, %97 : vector<16x128xf32>
    %c4_108 = arith.constant 4 : index
    %c0_109 = arith.constant 0 : index
    %c0_110 = arith.constant 0 : index
    %99 = vector.load %arg6[%c4_108, %c0_109, %c0_110] : memref<9x16x64xf32, #tpu.memory_space<vmem>>, vector<1x16x64xf32>
    %100 = vector.shape_cast %99 : vector<1x16x64xf32> to vector<16x64xf32>
    %cst_111 = arith.constant dense<0.000000e+00> : vector<16x64xf32>
    %101 = tpu.matmul %100, %67, %cst_111 {dimension_numbers = #tpu.dot_dimension_numbers<[1], [0], [0], [1], [0, 0, 1, 1], [], []>} : vector<16x64xf32>, vector<64x64xf32>, vector<16x64xf32> -> vector<16x64xf32>
    %c4_112 = arith.constant 4 : index
    %c0_113 = arith.constant 0 : index
    %c0_114 = arith.constant 0 : index
    %102 = vector.load %arg4[%c4_112, %c0_113, %c0_114] : memref<9x64x128xf32, #tpu.memory_space<vmem>>, vector<1x64x128xf32>
    %103 = vector.shape_cast %102 : vector<1x64x128xf32> to vector<64x128xf32>
    %cst_115 = arith.constant dense<0.000000e+00> : vector<16x128xf32>
    %104 = tpu.matmul %101, %103, %cst_115 {dimension_numbers = #tpu.dot_dimension_numbers<[1], [0], [0], [1], [0, 0, 1, 1], [], []>} : vector<16x64xf32>, vector<64x128xf32>, vector<16x128xf32> -> vector<16x128xf32>
    %105 = arith.addf %98, %104 : vector<16x128xf32>
    %c5_116 = arith.constant 5 : index
    %c0_117 = arith.constant 0 : index
    %c0_118 = arith.constant 0 : index
    %106 = vector.load %arg6[%c5_116, %c0_117, %c0_118] : memref<9x16x64xf32, #tpu.memory_space<vmem>>, vector<1x16x64xf32>
    %107 = vector.shape_cast %106 : vector<1x16x64xf32> to vector<16x64xf32>
    %cst_119 = arith.constant dense<0.000000e+00> : vector<16x64xf32>
    %108 = tpu.matmul %107, %67, %cst_119 {dimension_numbers = #tpu.dot_dimension_numbers<[1], [0], [0], [1], [0, 0, 1, 1], [], []>} : vector<16x64xf32>, vector<64x64xf32>, vector<16x64xf32> -> vector<16x64xf32>
    %c5_120 = arith.constant 5 : index
    %c0_121 = arith.constant 0 : index
    %c0_122 = arith.constant 0 : index
    %109 = vector.load %arg4[%c5_120, %c0_121, %c0_122] : memref<9x64x128xf32, #tpu.memory_space<vmem>>, vector<1x64x128xf32>
    %110 = vector.shape_cast %109 : vector<1x64x128xf32> to vector<64x128xf32>
    %cst_123 = arith.constant dense<0.000000e+00> : vector<16x128xf32>
    %111 = tpu.matmul %108, %110, %cst_123 {dimension_numbers = #tpu.dot_dimension_numbers<[1], [0], [0], [1], [0, 0, 1, 1], [], []>} : vector<16x64xf32>, vector<64x128xf32>, vector<16x128xf32> -> vector<16x128xf32>
    %112 = arith.addf %105, %111 : vector<16x128xf32>
    %c6_124 = arith.constant 6 : index
    %c0_125 = arith.constant 0 : index
    %c0_126 = arith.constant 0 : index
    %113 = vector.load %arg6[%c6_124, %c0_125, %c0_126] : memref<9x16x64xf32, #tpu.memory_space<vmem>>, vector<1x16x64xf32>
    %114 = vector.shape_cast %113 : vector<1x16x64xf32> to vector<16x64xf32>
    %cst_127 = arith.constant dense<0.000000e+00> : vector<16x64xf32>
    %115 = tpu.matmul %114, %67, %cst_127 {dimension_numbers = #tpu.dot_dimension_numbers<[1], [0], [0], [1], [0, 0, 1, 1], [], []>} : vector<16x64xf32>, vector<64x64xf32>, vector<16x64xf32> -> vector<16x64xf32>
    %c6_128 = arith.constant 6 : index
    %c0_129 = arith.constant 0 : index
    %c0_130 = arith.constant 0 : index
    %116 = vector.load %arg4[%c6_128, %c0_129, %c0_130] : memref<9x64x128xf32, #tpu.memory_space<vmem>>, vector<1x64x128xf32>
    %117 = vector.shape_cast %116 : vector<1x64x128xf32> to vector<64x128xf32>
    %cst_131 = arith.constant dense<0.000000e+00> : vector<16x128xf32>
    %118 = tpu.matmul %115, %117, %cst_131 {dimension_numbers = #tpu.dot_dimension_numbers<[1], [0], [0], [1], [0, 0, 1, 1], [], []>} : vector<16x64xf32>, vector<64x128xf32>, vector<16x128xf32> -> vector<16x128xf32>
    %119 = arith.addf %112, %118 : vector<16x128xf32>
    %c7_132 = arith.constant 7 : index
    %c0_133 = arith.constant 0 : index
    %c0_134 = arith.constant 0 : index
    %120 = vector.load %arg6[%c7_132, %c0_133, %c0_134] : memref<9x16x64xf32, #tpu.memory_space<vmem>>, vector<1x16x64xf32>
    %121 = vector.shape_cast %120 : vector<1x16x64xf32> to vector<16x64xf32>
    %cst_135 = arith.constant dense<0.000000e+00> : vector<16x64xf32>
    %122 = tpu.matmul %121, %67, %cst_135 {dimension_numbers = #tpu.dot_dimension_numbers<[1], [0], [0], [1], [0, 0, 1, 1], [], []>} : vector<16x64xf32>, vector<64x64xf32>, vector<16x64xf32> -> vector<16x64xf32>
    %c7_136 = arith.constant 7 : index
    %c0_137 = arith.constant 0 : index
    %c0_138 = arith.constant 0 : index
    %123 = vector.load %arg4[%c7_136, %c0_137, %c0_138] : memref<9x64x128xf32, #tpu.memory_space<vmem>>, vector<1x64x128xf32>
    %124 = vector.shape_cast %123 : vector<1x64x128xf32> to vector<64x128xf32>
    %cst_139 = arith.constant dense<0.000000e+00> : vector<16x128xf32>
    %125 = tpu.matmul %122, %124, %cst_139 {dimension_numbers = #tpu.dot_dimension_numbers<[1], [0], [0], [1], [0, 0, 1, 1], [], []>} : vector<16x64xf32>, vector<64x128xf32>, vector<16x128xf32> -> vector<16x128xf32>
    %126 = arith.addf %119, %125 : vector<16x128xf32>
    %c8_140 = arith.constant 8 : index
    %c0_141 = arith.constant 0 : index
    %c0_142 = arith.constant 0 : index
    %127 = vector.load %arg6[%c8_140, %c0_141, %c0_142] : memref<9x16x64xf32, #tpu.memory_space<vmem>>, vector<1x16x64xf32>
    %128 = vector.shape_cast %127 : vector<1x16x64xf32> to vector<16x64xf32>
    %cst_143 = arith.constant dense<0.000000e+00> : vector<16x64xf32>
    %129 = tpu.matmul %128, %67, %cst_143 {dimension_numbers = #tpu.dot_dimension_numbers<[1], [0], [0], [1], [0, 0, 1, 1], [], []>} : vector<16x64xf32>, vector<64x64xf32>, vector<16x64xf32> -> vector<16x64xf32>
    %c8_144 = arith.constant 8 : index
    %c0_145 = arith.constant 0 : index
    %c0_146 = arith.constant 0 : index
    %130 = vector.load %arg4[%c8_144, %c0_145, %c0_146] : memref<9x64x128xf32, #tpu.memory_space<vmem>>, vector<1x64x128xf32>
    %131 = vector.shape_cast %130 : vector<1x64x128xf32> to vector<64x128xf32>
    %cst_147 = arith.constant dense<0.000000e+00> : vector<16x128xf32>
    %132 = tpu.matmul %129, %131, %cst_147 {dimension_numbers = #tpu.dot_dimension_numbers<[1], [0], [0], [1], [0, 0, 1, 1], [], []>} : vector<16x64xf32>, vector<64x128xf32>, vector<16x128xf32> -> vector<16x128xf32>
    %133 = arith.addf %126, %132 : vector<16x128xf32>
    %cst_148 = arith.constant 0.000000e+00 : f32
    %134 = vector.broadcast %cst_148 : f32 to vector<16x128xf32>
    %135 = arith.maximumf %133, %134 : vector<16x128xf32>
    %c0_149 = arith.constant 0 : index
    %c0_150 = arith.constant 0 : index
    %c0_151 = arith.constant 0 : index
    %136 = vector.load %arg7[%c0_149, %c0_150, %c0_151] : memref<1x16x128xf32, #tpu.memory_space<vmem>>, vector<1x16x128xf32>
    %137 = vector.shape_cast %136 : vector<1x16x128xf32> to vector<16x128xf32>
    %138 = vector.shape_cast %135 : vector<16x128xf32> to vector<1x16x128xf32>
    tpu.vector_store %arg7[%c0_149, %c0_150, %c0_151], %138 {strides = array<i32>} : memref<1x16x128xf32, #tpu.memory_space<vmem>>, vector<1x16x128xf32>,
    return
  }
  func.func @transform_0(%arg0: i32) -> (i32, i32, i32, i32, i32) {
    %c0_i32 = arith.constant 0 : i32
    %c0_i32_0 = arith.constant 0 : i32
    %c0_i32_1 = arith.constant 0 : i32
    %c0_i32_2 = arith.constant 0 : i32
    %c0_i32_3 = arith.constant 0 : i32
    return %arg0, %c0_i32, %c0_i32_0, %c0_i32_1, %c0_i32_2 : i32, i32, i32, i32, i32
  }
  func.func @transform_1(%arg0: i32) -> (i32, i32, i32) {
    %c0_i32 = arith.constant 0 : i32
    %c0_i32_0 = arith.constant 0 : i32
    %c0_i32_1 = arith.constant 0 : i32
    %c0_i32_2 = arith.constant 0 : i32
    return %c0_i32, %c0_i32_0, %c0_i32_1 : i32, i32, i32
  }
  func.func @transform_2(%arg0: i32) -> (i32, i32) {
    %c0_i32 = arith.constant 0 : i32
    %c0_i32_0 = arith.constant 0 : i32
    %c0_i32_1 = arith.constant 0 : i32
    return %c0_i32, %c0_i32_0 : i32, i32
  }
  func.func @transform_3(%arg0: i32) -> (i32, i32, i32) {
    %c0_i32 = arith.constant 0 : i32
    %c0_i32_0 = arith.constant 0 : i32
    %c0_i32_1 = arith.constant 0 : i32
    %c0_i32_2 = arith.constant 0 : i32
    return %c0_i32, %c0_i32_0, %c0_i32_1 : i32, i32, i32
  }
  func.func @transform_4(%arg0: i32) -> (i32, i32) {
    %c0_i32 = arith.constant 0 : i32
    %c0_i32_0 = arith.constant 0 : i32
    %c0_i32_1 = arith.constant 0 : i32
    return %c0_i32, %c0_i32_0 : i32, i32
  }
  func.func @transform_5(%arg0: i32) -> (i32, i32, i32) {
    %c0_i32 = arith.constant 0 : i32
    %c0_i32_0 = arith.constant 0 : i32
    %c0_i32_1 = arith.constant 0 : i32
    %c0_i32_2 = arith.constant 0 : i32
    return %c0_i32, %c0_i32_0, %c0_i32_1 : i32, i32, i32
  }
  func.func @transform_6(%arg0: i32) -> (i32, i32, i32) {
    %c0_i32 = arith.constant 0 : i32
    %c0_i32_0 = arith.constant 0 : i32
    %c0_i32_1 = arith.constant 0 : i32
    return %arg0, %c0_i32, %c0_i32_0 : i32, i32, i32
  }
}

</mosaic_0001>

<bundles_post_ra>
// kernel: face_loc_encoder_forward.1
= control target key start
LH: loop header
LB: loop body
LE: loop exit
PB: predicated region body
PF: predicated region fallthrough
CT: control target
= control target key end

     0   :  { %vm39_vm0 = vcmask 64512   ;;  %vm1375_vm1 = vcmask 523264   ;;  %s4883_s1 = inlined_call_operand.vmem [shape: f32[9,8,64], index: 1, kind: input, shape index: {}]   ;;  %s4884_s0 = inlined_call_operand.vmem [shape: f32[1,4,9,9,8], index: 0, kind: input, shape index: {}]   ;;  %s4885_s5 = inlined_call_operand.vmem [shape: f32[9,16,64], index: 5, kind: input, shape index: {}]   ;;  %s4886_s2 = inlined_call_operand.vmem [shape: f32[1,64], index: 2, kind: input, shape index: {}]   ;;  %s4887_s3 = inlined_call_operand.vmem [shape: f32[9,64,128], index: 3, kind: input, shape index: {}]   ;;  %s4888_s4 = inlined_call_operand.vmem [shape: f32[1,128], index: 4, kind: input, shape index: {}]   ;;  %s4889_s6 = inlined_call_operand.vmem [shape: f32[1,16,128], index: 6, kind: output, shape index: {}]  }
   0x1   :  { %v38_v0 = vld [vmem:[%s4883_s1] sm:$0xff]  ;;  %v3998_v3 = vld [vmem:[%s4884_s0 + $0x50] sm:$0xff]  ;;  %v2981_v4 = vld [vmem:[%s4883_s1 + $0x8] sm:$0xff] }
   0x2   :  { %v3990_v1 = vld [vmem:[%s4884_s0 + $0x40] sm:$0xff]  ;;  %3947 = vmatprep.subr.mxu1 %v38_v0  ;;  %3479 = vmatprep.subr.mxu0 %v38_v0  ;;  %v4008_v5 = vld [vmem:[%s4884_s0 + $0x10] sm:$0xff]  ;;  %v3007_v10 = vld [vmem:[%s4883_s1 + $0x18] sm:$0xff] }
   0x3   :  { %v30_v2 = vld [vmem:[%s4884_s0] sm:$0xff]  ;;  %3948 = vmatpush3.msra.mxu1 %v38_v0  ;;  %3487 = vmatprep.mubr.msk.f32.mxu1 %vm39_vm0, %v3990_v1  ;;  %v2990_v6 = vld [vmem:[%s4883_s1 + $0x10] sm:$0xff]  ;;  %v3041_v19 = vld [vmem:[%s4883_s1 + $0x28] sm:$0xff] }
   0x4   :  { %3480 = vmatpush3.msra.mxu0 %v38_v0  ;;  %3481 = vmatprep.mubr.msk.f32.mxu0 %vm39_vm0, %v30_v2  ;;  %v4017_v7 = vld [vmem:[%s4884_s0 + $0x60] sm:$0xff]  ;;  %v4031_v9 = vld [vmem:[%s4884_s0 + $0x70] sm:$0xff]  ;;  %v3075_v37 = vld [vmem:[%s4883_s1 + $0x38] sm:$0xff] }
   0x5   :  { %3488 = vmatmul.mubr.msk.f32.vlgmr.msra.gmra.mxu1 %vm39_vm0, %v3998_v3  ;;  %3493 = vmatprep.subr.mxu1 %v2981_v4  ;;  %v4024_v8 = vld [vmem:[%s4884_s0 + $0x20] sm:$0xff]  ;;  %v4041_v11 = vld [vmem:[%s4884_s0 + $0x30] sm:$0xff] }
   0x6   :  { %3482 = vmatmul.mubr.msk.f32.vlgmr.msra.gmra.mxu0 %vm39_vm0, %v4008_v5  ;;  %3494 = vmatpush3.msra.mxu1 %v2981_v4  ;;  %v2973_v12 = vld [vmem:[%s4884_s0 + $0x90] sm:$0xff]  ;;  %v325_v13 = vld [vmem:[%s4884_s0 + $0x1] sm:$0xff] }
   0x7   :  { %3507 = vmatprep.subr.mxu0 %v2990_v6  ;;  %3490 = vmatprep.mubr.msk.f32.mxu1 %vm39_vm0, %v4017_v7  ;;  %v3024_v14 = vld [vmem:[%s4883_s1 + $0x20] sm:$0xff]  ;;  %v4068_v16 = vld [vmem:[%s4884_s0 + $0x11] sm:$0xff] }
   0x8   :  { %3508 = vmatpush3.msra.mxu0 %v2990_v6  ;;  %3484 = vmatprep.mubr.msk.f32.mxu0 %vm39_vm0, %v4024_v8  ;;  %v4062_v15 = vld [vmem:[%s4884_s0 + $0xa0] sm:$0xff]  ;;  %v4073_v17 = vld [vmem:[%s4884_s0 + $0xb0] sm:$0xff] }
   0x9   :  { %3491 = vmatmul.mubr.msk.f32.gmra.mxu1 %vm39_vm0, %v4031_v9  ;;  %3521 = vmatprep.subr.mxu1 %v3007_v10  ;;  %v4080_v18 = vld [vmem:[%s4884_s0 + $0x21] sm:$0xff]  ;;  %v3058_v21 = vld [vmem:[%s4883_s1 + $0x30] sm:$0xff] }
   0xa   :  { %3485 = vmatmul.mubr.msk.f32.gmra.mxu0 %vm39_vm0, %v4041_v11  ;;  %3495 = vmatprep.mubr.msk.f32.mxu1 %vm39_vm0, %v2973_v12  ;;  %v4090_v20 = vld [vmem:[%s4884_s0 + $0xc0] sm:$0xff]  ;;  %v4100_v22 = vld [vmem:[%s4884_s0 + $0x31] sm:$0xff] }
   0xb   :  { %3509 = vmatprep.mubr.msk.f32.mxu0 %vm39_vm0, %v325_v13  ;;  %3535 = vmatprep.subr.mxu0 %v3024_v14  ;;  %v4105_v23 = vld [vmem:[%s4884_s0 + $0xd0] sm:$0xff]  ;;  %v4112_v24 = vld [vmem:[%s4884_s0 + $0x41] sm:$0xff] }
   0xc   :  { %v4123_v25 = vld [vmem:[%s4884_s0 + $0xe0] sm:$0xff]  ;;  %v4130_v26 = vld [vmem:[%s4884_s0 + $0x51] sm:$0xff] }
   0xd   :  { %3496 = vmatmul.mubr.msk.f32.vlgmr.msra.gmra.mxu1 %vm39_vm0, %v4062_v15  ;;  %v4135_v27 = vld [vmem:[%s4884_s0 + $0xf0] sm:$0xff]  ;;  %v4140_v28 = vld [vmem:[%s4884_s0 + $0x61] sm:$0xff] }
   0xe   :  { %3510 = vmatmul.mubr.msk.f32.vlgmr.msra.gmra.mxu0 %vm39_vm0, %v4068_v16  ;;  %3522 = vmatpush3.msra.mxu1 %v3007_v10  ;;  %v4151_v29 = vld [vmem:[%s4884_s0 + $0x100] sm:$0xff]  ;;  %v4158_v30 = vld [vmem:[%s4884_s0 + $0x71] sm:$0xff] }
   0xf   :  { %3498 = vmatprep.mubr.msk.f32.mxu1 %vm39_vm0, %v4073_v17  ;;  %3536 = vmatpush3.msra.mxu0 %v3024_v14  ;;  %v2999_v31 = vld [vmem:[%s4884_s0 + $0x120] sm:$0xff]  ;;  %v3016_v32 = vld [vmem:[%s4884_s0 + $0x1b0] sm:$0xff] }
  0x10   :  { %3512 = vmatprep.mubr.msk.f32.mxu0 %vm39_vm0, %v4080_v18  ;;  %3549 = vmatprep.subr.mxu1 %v3041_v19  ;;  %v3000_v33 = vld [vmem:[%s4884_s0 + $0x130] sm:$0xff]  ;;  %v3017_v34 = vld [vmem:[%s4884_s0 + $0x1c0] sm:$0xff] }
  0x11   :  { %3499 = vmatmul.mubr.msk.f32.gmra.mxu1 %vm39_vm0, %v4090_v20  ;;  %3563 = vmatprep.subr.mxu0 %v3058_v21  ;;  %v3001_v35 = vld [vmem:[%s4884_s0 + $0x140] sm:$0xff]  ;;  %v3018_v36 = vld [vmem:[%s4884_s0 + $0x1d0] sm:$0xff] }
  0x12   :  { %3513 = vmatmul.mubr.msk.f32.gmra.mxu0 %vm39_vm0, %v4100_v22  ;;  %3501 = vmatprep.mubr.msk.f32.mxu1 %vm39_vm0, %v4105_v23  ;;  %v3002_v38 = vld [vmem:[%s4884_s0 + $0x150] sm:$0xff]  ;;  %v3092_v39 = vld [vmem:[%s4883_s1 + $0x40] sm:$0xff] }
  0x13   :  { %3515 = vmatprep.mubr.msk.f32.mxu0 %vm39_vm0, %v4112_v24  ;;  %v3019_v40 = vld [vmem:[%s4884_s0 + $0x1e0] sm:$0xff]  ;;  %v3020_v42 = vld [vmem:[%s4884_s0 + $0x1f0] sm:$0xff] }
  0x14   :  { %v3003_v41 = vld [vmem:[%s4884_s0 + $0x160] sm:$0xff]  ;;  %v3004_v43 = vld [vmem:[%s4884_s0 + $0x170] sm:$0xff] }
  0x15   :  { %3502 = vmatmul.mubr.msk.f32.gmra.mxu1 %vm39_vm0, %v4123_v25  ;;  %v3021_v44 = vld [vmem:[%s4884_s0 + $0x200] sm:$0xff]  ;;  %v3022_v46 = vld [vmem:[%s4884_s0 + $0x210] sm:$0xff] }
  0x16   :  { %3516 = vmatmul.mubr.msk.f32.gmra.mxu0 %vm39_vm0, %v4130_v26  ;;  %3504 = vmatprep.mubr.msk.f32.mxu1 %vm39_vm0, %v4135_v27  ;;  %v3005_v45 = vld [vmem:[%s4884_s0 + $0x180] sm:$0xff]  ;;  %v3006_v47 = vld [vmem:[%s4884_s0 + $0x190] sm:$0xff] }
  0x17   :  { %3518 = vmatprep.mubr.msk.f32.mxu0 %vm39_vm0, %v4140_v28  ;;  %v3023_v48 = vld [vmem:[%s4884_s0 + $0x220] sm:$0xff]  ;;  %v3034_v50 = vld [vmem:[%s4884_s0 + $0x131] sm:$0xff] }
  0x18   :  { %v3033_v49 = vld [vmem:[%s4884_s0 + $0x121] sm:$0xff]  ;;  %v3036_v52 = vld [vmem:[%s4884_s0 + $0x151] sm:$0xff] }
  0x19   :  { %3505 = vmatmul.mubr.msk.f32.gmra.mxu1 %vm39_vm0, %v4151_v29  ;;  %v3035_v51 = vld [vmem:[%s4884_s0 + $0x141] sm:$0xff]  ;;  %v3038_v54 = vld [vmem:[%s4884_s0 + $0x171] sm:$0xff] }
  0x1a   :  { %3519 = vmatmul.mubr.msk.f32.gmra.mxu0 %vm39_vm0, %v4158_v30  ;;  %3523 = vmatprep.mubr.msk.f32.mxu1 %vm39_vm0, %v2999_v31  ;;  %v3037_v53 = vld [vmem:[%s4884_s0 + $0x161] sm:$0xff]  ;;  %v3040_v56 = vld [vmem:[%s4884_s0 + $0x191] sm:$0xff] }
  0x1b   :  { %3537 = vmatprep.mubr.msk.f32.mxu0 %vm39_vm0, %v3016_v32  ;;  %v3039_v55 = vld [vmem:[%s4884_s0 + $0x181] sm:$0xff]  ;;  %v3074_v58 = vld [vmem:[%s4884_s0 + $0x110] sm:$0xff] }
  0x1c   :  { %v3057_v57 = vld [vmem:[%s4884_s0 + $0x80] sm:$0xff] }
  0x1d   :  { %3524 = vmatmul.mubr.msk.f32.vlgmr.msra.gmra.mxu1 %vm39_vm0, %v3000_v33  ;;  %v3091_v59 = vld [vmem:[%s4884_s0 + $0x81] sm:$0xff] }
  0x1e   :  { %3538 = vmatmul.mubr.msk.f32.vlgmr.msra.gmra.mxu0 %vm39_vm0, %v3017_v34  ;;  %3550 = vmatpush3.msra.mxu1 %v3041_v19  ;;  %v1373_v60 = vld [vmem:[%s4885_s5] sm:$0xff] }
  0x1f   :  { %3526 = vmatprep.mubr.msk.f32.mxu1 %vm39_vm0, %v3001_v35  ;;  %3564 = vmatpush3.msra.mxu0 %v3058_v21 }
  0x20   :  { %3540 = vmatprep.mubr.msk.f32.mxu0 %vm39_vm0, %v3018_v36  ;;  %3577 = vmatprep.subr.mxu1 %v3075_v37 }
  0x21   :  { %3527 = vmatmul.mubr.msk.f32.gmra.mxu1 %vm39_vm0, %v3002_v38  ;;  %3591 = vmatprep.subr.mxu0 %v3092_v39 }
  0x22   :  { %3541 = vmatmul.mubr.msk.f32.gmra.mxu0 %vm39_vm0, %v3019_v40  ;;  %3529 = vmatprep.mubr.msk.f32.mxu1 %vm39_vm0, %v3003_v41 }
  0x23   :  { %3543 = vmatprep.mubr.msk.f32.mxu0 %vm39_vm0, %v3020_v42 }
  0x25   :  { %3530 = vmatmul.mubr.msk.f32.gmra.mxu1 %vm39_vm0, %v3004_v43  ;;  %v2964_v43 = vld [vmem:[%s4886_s2] ss:$0 sm:$0xff] }
  0x26   :  { %3544 = vmatmul.mubr.msk.f32.gmra.mxu0 %vm39_vm0, %v3021_v44  ;;  %3532 = vmatprep.mubr.msk.f32.mxu1 %vm39_vm0, %v3005_v45 }
  0x27   :  { %3546 = vmatprep.mubr.msk.f32.mxu0 %vm39_vm0, %v3022_v46 }
  0x29   :  { %3533 = vmatmul.mubr.msk.f32.gmra.mxu1 %vm39_vm0, %v3006_v47 }
  0x2a   :  { %3547 = vmatmul.mubr.msk.f32.gmra.mxu0 %vm39_vm0, %v3023_v48  ;;  %3551 = vmatprep.mubr.msk.f32.mxu1 %vm39_vm0, %v3033_v49 }
  0x2b   :  { %3565 = vmatprep.mubr.msk.f32.mxu0 %vm39_vm0, %v4008_v5 }
  0x2d   :  { %3552 = vmatmul.mubr.msk.f32.vlgmr.msra.gmra.mxu1 %vm39_vm0, %v3034_v50 }
  0x2e   :  { %3566 = vmatmul.mubr.msk.f32.vlgmr.msra.gmra.mxu0 %vm39_vm0, %v4024_v8  ;;  %3578 = vmatpush3.msra.mxu1 %v3075_v37 }
  0x2f   :  { %3554 = vmatprep.mubr.msk.f32.mxu1 %vm39_vm0, %v3035_v51  ;;  %3592 = vmatpush3.msra.mxu0 %v3092_v39 }
  0x30   :  { %3568 = vmatprep.mubr.msk.f32.mxu0 %vm39_vm0, %v4041_v11 }
  0x31   :  { %3555 = vmatmul.mubr.msk.f32.gmra.mxu1 %vm39_vm0, %v3036_v52 }
  0x32   :  { %3569 = vmatmul.mubr.msk.f32.gmra.mxu0 %vm39_vm0, %v3990_v1  ;;  %3557 = vmatprep.mubr.msk.f32.mxu1 %vm39_vm0, %v3037_v53 }
  0x33   :  { %3571 = vmatprep.mubr.msk.f32.mxu0 %vm39_vm0, %v3998_v3 }
  0x35   :  { %3558 = vmatmul.mubr.msk.f32.gmra.mxu1 %vm39_vm0, %v3038_v54 }
  0x36   :  { %3572 = vmatmul.mubr.msk.f32.gmra.mxu0 %vm39_vm0, %v4017_v7  ;;  %3560 = vmatprep.mubr.msk.f32.mxu1 %vm39_vm0, %v3039_v55 }
  0x37   :  { %3574 = vmatprep.mubr.msk.f32.mxu0 %vm39_vm0, %v4031_v9 }
  0x39   :  { %3561 = vmatmul.mubr.msk.f32.gmra.mxu1 %vm39_vm0, %v3040_v56 }
  0x3a   :  { %3575 = vmatmul.mubr.msk.f32.gmra.mxu0 %vm39_vm0, %v3057_v57  ;;  %3579 = vmatprep.mubr.msk.f32.mxu1 %vm39_vm0, %v4062_v15 }
  0x3b   :  { %3593 = vmatprep.mubr.msk.f32.mxu0 %vm39_vm0, %v4068_v16 }
  0x3d   :  { %3580 = vmatmul.mubr.msk.f32.vlgmr.msra.gmra.mxu1 %vm39_vm0, %v4073_v17 }
  0x3e   :  { %3594 = vmatmul.mubr.msk.f32.vlgmr.msra.gmra.mxu0 %vm39_vm0, %v4080_v18  ;;  %3582 = vmatprep.mubr.msk.f32.mxu1 %vm39_vm0, %v4090_v20 }
  0x3f   :  { %3596 = vmatprep.mubr.msk.f32.mxu0 %vm39_vm0, %v4100_v22 }
  0x41   :  { %3583 = vmatmul.mubr.msk.f32.gmra.mxu1 %vm39_vm0, %v4105_v23 }
  0x42   :  { %3597 = vmatmul.mubr.msk.f32.gmra.mxu0 %vm39_vm0, %v4112_v24  ;;  %3585 = vmatprep.mubr.msk.f32.mxu1 %vm39_vm0, %v4123_v25 }
  0x43   :  { %3599 = vmatprep.mubr.msk.f32.mxu0 %vm39_vm0, %v4130_v26 }
  0x45   :  { %3586 = vmatmul.mubr.msk.f32.gmra.mxu1 %vm39_vm0, %v4135_v27 }
  0x46   :  { %3600 = vmatmul.mubr.msk.f32.gmra.mxu0 %vm39_vm0, %v4140_v28  ;;  %3588 = vmatprep.mubr.msk.f32.mxu1 %vm39_vm0, %v4151_v29 }
  0x47   :  { %3602 = vmatprep.mubr.msk.f32.mxu0 %vm39_vm0, %v4158_v30 }
  0x49   :  { %3589 = vmatmul.mubr.msk.f32.gmra.mxu1 %vm39_vm0, %v3074_v58 }
  0x4a   :  { %3603 = vmatmul.mubr.msk.f32.gmra.mxu0 %vm39_vm0, %v3091_v59  ;;  %3621 = vmatprep.mubr.msk.f32.mxu1 %vm1375_vm1, %v1373_v60 }
  0xc5   :  { %v3489_v61 = vpop.f32.mrf.mxu1 }
  0xc6   :  { %v4324_v62 = vpop.f32.mrf.mxu0  ;;  %v174_v47 = vadd.f32 %v3489_v61, %v2964_v43 }
  0xc7   :  { %v150_v63 = vpop.f32.mrf.mxu1  ;;  %v170_v61 = vadd.f32 %v4324_v62, %v2964_v43 }
  0xc8   :  { %v4326_v0 = vpop.f32.mrf.mxu0  ;;  %v173_v51 = vadd.f32 %v2964_v43, %v150_v63 }
  0xc9   :  { %v3492_v1 = vpop.f32.mrf.mxu1 }
  0xca   :  { %v3486_v2 = vpop.f32.mrf.mxu0  ;;  %v176_v48 = vadd.f32 %v3492_v1, %v2964_v43 }
  0xcb   :  { %v160_v3 = vpop.f32.mrf.mxu1  ;;  %v172_v57 = vadd.f32 %v3486_v2, %v2964_v43  ;;  %v169_v2 = vadd.f32 %v2964_v43, %v4326_v0 }
  0xcc   :  { %v140_v4 = vpop.f32.mrf.mxu0  ;;  %v175_v52 = vadd.f32 %v2964_v43, %v160_v3 }
  0xcd   :  { %v4328_v5 = vpop.f32.mrf.mxu1 }
  0xce   :  { %v4330_v6 = vpop.f32.mrf.mxu0 }
  0xcf   :  { %v4332_v7 = vpop.f32.mrf.mxu1 }
  0xd0   :  { %v4334_v8 = vpop.f32.mrf.mxu0 }
  0xd1   :  { %v3500_v9 = vpop.f32.mrf.mxu1 }
  0xd2   :  { %v4336_v10 = vpop.f32.mrf.mxu0 }
  0xd3   :  { %v288_v11 = vpop.f32.mrf.mxu1 }
  0xd4   :  { %v4338_v12 = vpop.f32.mrf.mxu0 }
  0xd5   :  { %v3503_v13 = vpop.f32.mrf.mxu1 }
  0xd6   :  { %v3517_v14 = vpop.f32.mrf.mxu0  ;;  %v322_v53 = vadd.f32 %v3503_v13, %v174_v47 }
  0xd7   :  { %v298_v15 = vpop.f32.mrf.mxu1 }
  0xd8   :  { %v445_v16 = vpop.f32.mrf.mxu0  ;;  %v321_v58 = vadd.f32 %v298_v15, %v173_v51 }
  0xd9   :  { %v3506_v17 = vpop.f32.mrf.mxu1 }
  0xda   :  { %v3520_v18 = vpop.f32.mrf.mxu0  ;;  %v324_v54 = vadd.f32 %v3506_v17, %v176_v48  ;;  %v468_v63 = vadd.f32 %v445_v16, %v321_v58 }
  0xdb   :  { %v308_v19 = vpop.f32.mrf.mxu1 }
  0xdc   :  { %v455_v20 = vpop.f32.mrf.mxu0  ;;  %v323_v59 = vadd.f32 %v308_v19, %v175_v52 }
  0xdd   :  { %v4340_v21 = vpop.f32.mrf.mxu1 }
  0xde   :  { %v4342_v22 = vpop.f32.mrf.mxu0  ;;  %v470_v3 = vadd.f32 %v455_v20, %v323_v59 }
  0xdf   :  { %v4344_v23 = vpop.f32.mrf.mxu1 }
  0xe0   :  { %v4346_v24 = vpop.f32.mrf.mxu0 }
  0xe1   :  { %4890 = vst [vmem:[#allocation2_spill] sm:$0xff] %v4346_v24  ;;  %v3528_v25 = vpop.f32.mrf.mxu1 }
  0xe2   :  { %v4348_v26 = vpop.f32.mrf.mxu0 }
  0xe3   :  { %v4350_v27 = vpop.f32.mrf.mxu1 }
  0xe4   :  { %v4352_v28 = vpop.f32.mrf.mxu0 }
  0xe5   :  { %v3531_v29 = vpop.f32.mrf.mxu1 }
  0xe6   :  { %v3545_v30 = vpop.f32.mrf.mxu0 }
  0xe7   :  { %v593_v31 = vpop.f32.mrf.mxu1 }
  0xe8   :  { %v741_v32 = vpop.f32.mrf.mxu0 }
  0xe9   :  { %v3534_v33 = vpop.f32.mrf.mxu1 }
  0xea   :  { %v3548_v34 = vpop.f32.mrf.mxu0 }
  0xeb   :  { %v603_v35 = vpop.f32.mrf.mxu1 }
  0xec   :  { %v751_v36 = vpop.f32.mrf.mxu0 }
  0xed   :  { %v4354_v37 = vpop.f32.mrf.mxu1 }
  0xee   :  { %4891 = vst [vmem:[#allocation3_spill] sm:$0xff] %v4354_v37  ;;  %v4356_v38 = vpop.f32.mrf.mxu0 }
  0xef   :  { %4892 = vst [vmem:[#allocation4_spill] sm:$0xff] %v4356_v38  ;;  %v4358_v39 = vpop.f32.mrf.mxu1 }
  0xf0   :  { %4893 = vst [vmem:[#allocation5_spill] sm:$0xff] %v4358_v39  ;;  %v4360_v40 = vpop.f32.mrf.mxu0  ;;  %v320_v39 = vadd.f32 %v3500_v9, %v172_v57  ;;  %v4897_v57 = vld [vmem:[#allocation2_spill] sm:$0xff] }
  0xf1   :  { %4894 = vst [vmem:[#allocation6_spill] sm:$0xff] %v4360_v40  ;;  %v4362_v41 = vpop.f32.mrf.mxu1  ;;  %v171_v40 = vadd.f32 %v2964_v43, %v140_v4  ;;  %v318_v4 = vadd.f32 %v4328_v5, %v170_v61 }
  0xf2   :  { %v4364_v42 = vpop.f32.mrf.mxu0  ;;  %v467_v9 = vadd.f32 %v4336_v10, %v320_v39 }
  0xf3   :  { %4895 = vst [vmem:[#allocation7_spill] sm:$0xff] %v4364_v42  ;;  %v4369_v44 = vpop.f32.mrf.mxu1  ;;  %v469_v42 = vadd.f32 %v3517_v14, %v322_v53  ;;  %v319_v1 = vadd.f32 %v288_v11, %v171_v40  ;;  %v616_v14 = vadd.f32 %v593_v31, %v468_v63  ;;  %v317_v11 = vadd.f32 %v4332_v7, %v169_v2 }
  0xf4   :  { %v4371_v45 = vpop.f32.mrf.mxu0  ;;  %v615_v20 = vadd.f32 %v3528_v25, %v467_v9  ;;  %v465_v0 = vadd.f32 %v4330_v6, %v318_v4 }
  0xf5   :  { %4896 = vst [vmem:[#allocation8_spill] sm:$0xff] %v4371_v45  ;;  %v3559_v46 = vpop.f32.mrf.mxu1  ;;  %v471_v45 = vadd.f32 %v3520_v18, %v324_v54  ;;  %v617_v13 = vadd.f32 %v3531_v29, %v469_v42  ;;  %v618_v18 = vadd.f32 %v603_v35, %v470_v3  ;;  %v466_v16 = vadd.f32 %v4338_v12, %v319_v1  ;;  %v4898_v58 = vld [vmem:[#allocation3_spill] sm:$0xff] }
  0xf6   :  { %v3573_v49 = vpop.f32.mrf.mxu0  ;;  %v764_v43 = vadd.f32 %v741_v32, %v616_v14  ;;  %v613_v7 = vadd.f32 %v4340_v21, %v465_v0  ;;  %v763_v25 = vadd.f32 %v4348_v26, %v615_v20  ;;  %v4902_v4 = vld [vmem:[#allocation4_spill] sm:$0xff] }
  0xf7   :  { %v888_v50 = vpop.f32.mrf.mxu1  ;;  %v619_v17 = vadd.f32 %v3534_v33, %v471_v45  ;;  %v765_v29 = vadd.f32 %v3545_v30, %v617_v13  ;;  %v614_v5 = vadd.f32 %v4350_v27, %v466_v16  ;;  %v766_v10 = vadd.f32 %v751_v36, %v618_v18  ;;  %v4900_v63 = vld [vmem:[#allocation5_spill] sm:$0xff] }
  0xf8   :  { %v1036_v55 = vpop.f32.mrf.mxu0  ;;  %v464_v45 = vadd.f32 %v4334_v8, %v317_v11  ;;  %v911_v30 = vadd.f32 %v888_v50, %v764_v43  ;;  %v910_v32 = vadd.f32 %v4362_v41, %v763_v25  ;;  %v761_v8 = vadd.f32 %v4342_v22, %v613_v7  ;;  %v4903_v16 = vld [vmem:[#allocation6_spill] sm:$0xff]  ;;  %v1459_v25 = vld [vmem:[%s4887_s3 + $0x10] sm:$0xff] }
  0xf9   :  { %v3562_v56 = vpop.f32.mrf.mxu1  ;;  %v767_v33 = vadd.f32 %v3548_v34, %v619_v17  ;;  %v912_v31 = vadd.f32 %v3559_v46, %v765_v29  ;;  %v762_v27 = vadd.f32 %v4352_v28, %v614_v5  ;;  %v1461_v7 = vld [vmem:[%s4887_s3 + $0x20] sm:$0xff] }
  0xfa   :  { %v3576_v60 = vpop.f32.mrf.mxu0  ;;  %v612_v6 = vadd.f32 %v4344_v23, %v464_v45  ;;  %v1059_v54 = vadd.f32 %v1036_v55, %v911_v30  ;;  %v908_v28 = vadd.f32 %v4898_v58, %v761_v8  ;;  %v4899_v61 = vld [vmem:[#allocation7_spill] sm:$0xff]  ;;  %v3107_v30 = vld [vmem:[%s4885_s5 + $0x18] sm:$0xff]  ;;  %v3116_v58 = vld [vmem:[%s4887_s3 + $0x70] sm:$0xff] }
  0xfb   :  { %v898_v38 = vpop.f32.mrf.mxu1  ;;  %v914_v35 = vadd.f32 %v3562_v56, %v767_v33  ;;  %v1060_v36 = vadd.f32 %v3573_v49, %v912_v31  ;;  %v909_v21 = vadd.f32 %v4369_v44, %v762_v27  ;;  %v1058_v41 = vadd.f32 %v4899_v61, %v910_v32  ;;  %v3106_v31 = vld [vmem:[%s4885_s5 + $0x10] sm:$0xff]  ;;  %v1462_v45 = vld [vmem:[%s4887_s3 + $0x28] sm:$0xff]  ;;  %v3135_v27 = vld [vmem:[%s4885_s5 + $0x38] sm:$0xff] }
  0xfc   :  { %v1046_v37 = vpop.f32.mrf.mxu0  ;;  %v913_v34 = vadd.f32 %v898_v38, %v766_v10  ;;  %v760_v23 = vadd.f32 %v4897_v57, %v612_v6  ;;  %v4901_v3 = vld [vmem:[#allocation8_spill] sm:$0xff]  ;;  %v1056_v9 = vadd.f32 %v4902_v4, %v908_v28  ;;  %v3149_v32 = vld [vmem:[%s4885_s5 + $0x48] sm:$0xff]  ;;  %v4576_v8 = vld [vmem:[%s4887_s3 + $0x78] sm:$0xff] }
  0xfd   :  { %v4374_v24 = vpop.f32.mrf.mxu1  ;;  %v1062_v46 = vadd.f32 %v3576_v60, %v914_v35  ;;  %v1057_v44 = vadd.f32 %v4901_v3, %v909_v21  ;;  %v1464_v35 = vld [vmem:[%s4887_s3 + $0x38] sm:$0xff]  ;;  %v3134_v6 = vld [vmem:[%s4885_s5 + $0x30] sm:$0xff]  ;;  %v3115_v28 = vld [vmem:[%s4887_s3 + $0x68] sm:$0xff] }
  0xfe   :  { %v4376_v47 = vpop.f32.mrf.mxu0  ;;  %v1061_v26 = vadd.f32 %v1046_v37, %v913_v34  ;;  %v907_v22 = vadd.f32 %v4900_v63, %v760_v23  ;;  %v1204_v29 = vadd.f32 %v4374_v24, %v1056_v9  ;;  %3624 = vmatprep.subr.mxu0 %v1464_v35  ;;  %v3120_v34 = vld [vmem:[%s4885_s5 + $0x20] sm:$0xff]  ;;  %v3163_v21 = vld [vmem:[%s4885_s5 + $0x58] sm:$0xff]  ;;  %v3130_v3 = vld [vmem:[%s4887_s3 + $0xb0] sm:$0xff] }
  0xff   :  { %v4380_v15 = vpop.f32.mrf.mxu1  ;;  %3625 = vmatpush3.msra.mxu0 %v1464_v35  ;;  %v3113_v61 = vld [vmem:[%s4887_s3 + $0x58] sm:$0xff] }
 0x100   :  { %v4383_v62 = vpop.f32.mrf.mxu0  ;;  %v1055_v20 = vadd.f32 %v4903_v16, %v907_v22  ;;  %v1351_v43 = vadd.f32 %v4376_v47, %v1204_v29  ;;  %v3131_v63 = vld [vmem:[%s4887_s3 + $0xb8] sm:$0xff]  ;;  %v3142_v16 = vld [vmem:[%s4887_s3 + $0xe0] sm:$0xff]  ;;  %v3140_v29 = vld [vmem:[%s4887_s3 + $0xd0] sm:$0xff] }
 0x101   :  { %v3584_v19 = vpop.f32.mrf.mxu1  ;;  %v3145_v9 = vld [vmem:[%s4887_s3 + $0xf8] sm:$0xff] }
 0x102   :  { %v3598_v40 = vpop.f32.mrf.mxu0  ;;  %v1206_v55 = vadd.f32 %v3584_v19, %v1058_v41  ;;  %v1203_v0 = vadd.f32 %v4380_v15, %v1055_v20  ;;  %v4430_v15 = vmax.f32 %v1351_v43, 0.0  ;;  %v3112_v41 = vld [vmem:[%s4887_s3 + $0x50] sm:$0xff]  ;;  %v3141_v20 = vld [vmem:[%s4887_s3 + $0xd8] sm:$0xff] }
 0x103   :  { %v1174_v42 = vpop.f32.mrf.mxu1  ;;  %v3158_v43 = vld [vmem:[%s4887_s3 + $0x130] sm:$0xff]  ;;  %v3173_v35 = vld [vmem:[%s4887_s3 + $0x178] sm:$0xff] }
 0x104   :  { %v1321_v39 = vpop.f32.mrf.mxu0  ;;  %v1205_v14 = vadd.f32 %v1174_v42, %v1057_v44  ;;  %v1353_v33 = vadd.f32 %v3598_v40, %v1206_v55  ;;  %v1350_v24 = vadd.f32 %v4383_v62, %v1203_v0  ;;  %v1374_v62 = vld [vmem:[%s4885_s5 + $0x8] sm:$0xff]  ;;  %v3127_v55 = vld [vmem:[%s4887_s3 + $0x98] sm:$0xff] }
 0x105   :  { %v3587_v12 = vpop.f32.mrf.mxu1  ;;  %v3129_v44 = vld [vmem:[%s4887_s3 + $0xa8] sm:$0xff] }
 0x106   :  { %v3601_v48 = vpop.f32.mrf.mxu0  ;;  %v1208_v50 = vadd.f32 %v3587_v12, %v1060_v36  ;;  %v1352_v5 = vadd.f32 %v1321_v39, %v1205_v14  ;;  %v4421_v10 = vmax.f32 %v1353_v33, 0.0  ;;  %v4434_v47 = vmax.f32 %v1350_v24, 0.0  ;;  %v1463_v39 = vld [vmem:[%s4887_s3 + $0x30] sm:$0xff]  ;;  %v1460_v12 = vld [vmem:[%s4887_s3 + $0x18] sm:$0xff]  ;;  %v3139_v33 = vld [vmem:[%s4887_s3 + $0xc8] sm:$0xff] }
 0x107   :  { %v1184_v51 = vpop.f32.mrf.mxu1  ;;  %3626 = vmatprep.subr.mxu0 %v1463_v39  ;;  %v3162_v36 = vld [vmem:[%s4885_s5 + $0x50] sm:$0xff]  ;;  %v3156_v24 = vld [vmem:[%s4887_s3 + $0x120] sm:$0xff] }
 0x108   :  { %v1331_v52 = vpop.f32.mrf.mxu0  ;;  %v1207_v49 = vadd.f32 %v1184_v51, %v1059_v54  ;;  %v1355_v37 = vadd.f32 %v3601_v48, %v1208_v50  ;;  %v4426_v40 = vmax.f32 %v1352_v5, 0.0  ;;  %3627 = vmatpush3.msra.mxu0 %v1463_v39  ;;  %v3121_v48 = vld [vmem:[%s4885_s5 + $0x28] sm:$0xff]  ;;  %v3148_v51 = vld [vmem:[%s4885_s5 + $0x40] sm:$0xff]  ;;  %v3191_v50 = vld [vmem:[%s4885_s5 + $0x78] sm:$0xff] }
 0x109   :  { %v3590_v53 = vpop.f32.mrf.mxu1  ;;  %3628 = vmatprep.subr.mxu0 %v1462_v45  ;;  %v3177_v54 = vld [vmem:[%s4885_s5 + $0x68] sm:$0xff]  ;;  %v3159_v5 = vld [vmem:[%s4887_s3 + $0x138] sm:$0xff] }
 0x10a   :  { %v1210_v38 = vadd.f32 %v3590_v53, %v1062_v46  ;;  %v3604_v56 = vpop.f32.mrf.mxu0  ;;  %v1354_v18 = vadd.f32 %v1331_v52, %v1207_v49  ;;  %v4411_v19 = vmax.f32 %v1355_v37, 0.0  ;;  %3629 = vmatpush3.msra.mxu0 %v1462_v45  ;;  %v1458_v46 = vld [vmem:[%s4887_s3 + $0x8] sm:$0xff]  ;;  %v1457_v52 = vld [vmem:[%s4887_s3] sm:$0xff]  ;;  %v3126_v37 = vld [vmem:[%s4887_s3 + $0x90] sm:$0xff] }
 0x10b   :  { %v1194_v59 = vpop.f32.mrf.mxu1  ;;  %3630 = vmatprep.subr.mxu0 %v1461_v7  ;;  %v3176_v53 = vld [vmem:[%s4885_s5 + $0x60] sm:$0xff]  ;;  %v3111_v49 = vld [vmem:[%s4887_s3 + $0x48] sm:$0xff]  ;;  %v3172_v45 = vld [vmem:[%s4887_s3 + $0x170] sm:$0xff] }
 0x10c   :  { %v1357_v60 = vadd.f32 %v3604_v56, %v1210_v38  ;;  %v1209_v1 = vadd.f32 %v1194_v59, %v1061_v26  ;;  %v1341_v13 = vpop.f32.mrf.mxu0  ;;  %v4416_v42 = vmax.f32 %v1354_v18, 0.0  ;;  %3631 = vmatpush3.msra.mxu0 %v1461_v7  ;;  %v3190_v26 = vld [vmem:[%s4885_s5 + $0x70] sm:$0xff]  ;;  %v3204_v38 = vld [vmem:[%s4885_s5 + $0x80] sm:$0xff]  ;;  %v3205_v56 = vld [vmem:[%s4885_s5 + $0x88] sm:$0xff] }
 0x10d   :  { %3632 = vmatprep.subr.mxu0 %v1460_v12  ;;  %v3114_v59 = vld [vmem:[%s4887_s3 + $0x60] sm:$0xff]  ;;  %v3144_v18 = vld [vmem:[%s4887_s3 + $0xf0] sm:$0xff]  ;;  %v3171_v7 = vld [vmem:[%s4887_s3 + $0x168] sm:$0xff] }
 0x10e   :  { %v4402_v17 = vmax.f32 %v1357_v60, 0.0  ;;  %v1356_v2 = vadd.f32 %v1341_v13, %v1209_v1  ;;  %3633 = vmatpush3.msra.mxu0 %v1460_v12  ;;  %v3110_v60 = vld [vmem:[%s4887_s3 + $0x40] sm:$0xff] }
 0x10f   :  { %3634 = vmatprep.subr.mxu0 %v1459_v25  ;;  %v3128_v13 = vld [vmem:[%s4887_s3 + $0xa0] sm:$0xff] }
 0x110   :  { %v4405_v11 = vmax.f32 %v1356_v2, 0.0  ;;  %3605 = vmatprep.subr.mxu1 %v4402_v17  ;;  %3635 = vmatpush3.msra.mxu0 %v1459_v25  ;;  %v3124_v2 = vld [vmem:[%s4887_s3 + $0x80] sm:$0xff]  ;;  %v3169_v25 = vld [vmem:[%s4887_s3 + $0x158] sm:$0xff] }
 0x111   :  { %3606 = vmatpush3.msra.mxu1 %v4402_v17  ;;  %3636 = vmatprep.subr.mxu0 %v1458_v46  ;;  %v3170_v12 = vld [vmem:[%s4887_s3 + $0x160] sm:$0xff] }
 0x112   :  { %3607 = vmatprep.subr.mxu1 %v4405_v11  ;;  %3637 = vmatpush3.msra.mxu0 %v1458_v46  ;;  %v3184_v46 = vld [vmem:[%s4887_s3 + $0x1a0] sm:$0xff] }
 0x113   :  { %3608 = vmatpush3.msra.mxu1 %v4405_v11  ;;  %3638 = vmatprep.subr.mxu0 %v1457_v52 }
 0x114   :  { %3609 = vmatprep.subr.mxu1 %v4411_v19  ;;  %3639 = vmatpush3.msra.mxu0 %v1457_v52  ;;  %v3183_v52 = vld [vmem:[%s4887_s3 + $0x198] sm:$0xff] }
 0x115   :  { %3610 = vmatpush3.msra.mxu1 %v4411_v19  ;;  %3662 = vmatprep.subr.mxu0 %v4576_v8 }
 0x116   :  { %3611 = vmatprep.subr.mxu1 %v4416_v42 }
 0x117   :  { %3612 = vmatpush3.msra.mxu1 %v4416_v42 }
 0x118   :  { %3613 = vmatprep.subr.mxu1 %v4421_v10 }
 0x119   :  { %3614 = vmatpush3.msra.mxu1 %v4421_v10 }
 0x11a   :  { %3615 = vmatprep.subr.mxu1 %v4426_v40 }
 0x11b   :  { %3616 = vmatpush3.msra.mxu1 %v4426_v40 }
 0x11c   :  { %3617 = vmatprep.subr.mxu1 %v4430_v15 }
 0x11d   :  { %3618 = vmatpush3.msra.mxu1 %v4430_v15 }
 0x11e   :  { %3619 = vmatprep.subr.mxu1 %v4434_v47 }
 0x11f   :  { %3620 = vmatpush3.msra.mxu1 %v4434_v47 }
 0x120   :  { %3622 = vmatmul.mubr.msk.f32.vlgmr.msra.gmra.mxu1 %vm1375_vm1, %v1374_v62  ;;  %3643 = vmatprep.subr.mxu1 %v4402_v17  ;;  %v3152_v62 = vld [vmem:[%s4887_s3 + $0x100] sm:$0xff] }
 0x121   :  { %3644 = vmatpush3.msra.mxu1 %v4402_v17  ;;  %3659 = vmatprep.mubr.msk.f32.mxu1 %vm1375_vm1, %v3106_v31 }
 0x122   :  { %3645 = vmatprep.subr.mxu1 %v4405_v11 }
 0x123   :  { %3646 = vmatpush3.msra.mxu1 %v4405_v11 }
 0x124   :  { %3647 = vmatprep.subr.mxu1 %v4411_v19 }
 0x125   :  { %3648 = vmatpush3.msra.mxu1 %v4411_v19 }
 0x126   :  { %3649 = vmatprep.subr.mxu1 %v4416_v42 }
 0x127   :  { %3650 = vmatpush3.msra.mxu1 %v4416_v42 }
 0x128   :  { %3651 = vmatprep.subr.mxu1 %v4421_v10 }
 0x129   :  { %3652 = vmatpush3.msra.mxu1 %v4421_v10 }
 0x12a   :  { %3653 = vmatprep.subr.mxu1 %v4426_v40 }
 0x12b   :  { %3654 = vmatpush3.msra.mxu1 %v4426_v40 }
 0x12c   :  { %3655 = vmatprep.subr.mxu1 %v4430_v15 }
 0x12d   :  { %3656 = vmatpush3.msra.mxu1 %v4430_v15 }
 0x12e   :  { %3657 = vmatprep.subr.mxu1 %v4434_v47 }
 0x12f   :  { %3658 = vmatpush3.msra.mxu1 %v4434_v47 }
 0x130   :  { %3660 = vmatmul.mubr.msk.f32.vlgmr.msra.gmra.mxu1 %vm1375_vm1, %v3107_v30  ;;  %3681 = vmatprep.subr.mxu1 %v4402_v17  ;;  %v3168_v30 = vld [vmem:[%s4887_s3 + $0x150] sm:$0xff] }
 0x131   :  { %3682 = vmatpush3.msra.mxu1 %v4402_v17  ;;  %3697 = vmatprep.mubr.msk.f32.mxu1 %vm1375_vm1, %v3120_v34  ;;  %v3167_v34 = vld [vmem:[%s4887_s3 + $0x148] sm:$0xff] }
 0x132   :  { %3683 = vmatprep.subr.mxu1 %v4405_v11 }
 0x133   :  { %3684 = vmatpush3.msra.mxu1 %v4405_v11 }
 0x134   :  { %3685 = vmatprep.subr.mxu1 %v4411_v19 }
 0x135   :  { %3686 = vmatpush3.msra.mxu1 %v4411_v19 }
 0x136   :  { %3687 = vmatprep.subr.mxu1 %v4416_v42 }
 0x137   :  { %3688 = vmatpush3.msra.mxu1 %v4416_v42 }
 0x138   :  { %3689 = vmatprep.subr.mxu1 %v4421_v10 }
 0x139   :  { %3690 = vmatpush3.msra.mxu1 %v4421_v10 }
 0x13a   :  { %3691 = vmatprep.subr.mxu1 %v4426_v40 }
 0x13b   :  { %3692 = vmatpush3.msra.mxu1 %v4426_v40 }
 0x13c   :  { %3693 = vmatprep.subr.mxu1 %v4430_v15 }
 0x13d   :  { %3694 = vmatpush3.msra.mxu1 %v4430_v15 }
 0x13e   :  { %3695 = vmatprep.subr.mxu1 %v4434_v47 }
 0x13f   :  { %3696 = vmatpush3.msra.mxu1 %v4434_v47 }
 0x140   :  { %3698 = vmatmul.mubr.msk.f32.vlgmr.msra.gmra.mxu1 %vm1375_vm1, %v3121_v48  ;;  %3719 = vmatprep.subr.mxu1 %v4402_v17  ;;  %v3166_v48 = vld [vmem:[%s4887_s3 + $0x140] sm:$0xff] }
 0x141   :  { %3720 = vmatpush3.msra.mxu1 %v4402_v17  ;;  %3735 = vmatprep.mubr.msk.f32.mxu1 %vm1375_vm1, %v3134_v6 }
 0x142   :  { %3721 = vmatprep.subr.mxu1 %v4405_v11 }
 0x143   :  { %3722 = vmatpush3.msra.mxu1 %v4405_v11 }
 0x144   :  { %3723 = vmatprep.subr.mxu1 %v4411_v19 }
 0x145   :  { %3724 = vmatpush3.msra.mxu1 %v4411_v19 }
 0x146   :  { %3725 = vmatprep.subr.mxu1 %v4416_v42 }
 0x147   :  { %3726 = vmatpush3.msra.mxu1 %v4416_v42 }
 0x148   :  { %3727 = vmatprep.subr.mxu1 %v4421_v10 }
 0x149   :  { %3728 = vmatpush3.msra.mxu1 %v4421_v10 }
 0x14a   :  { %3729 = vmatprep.subr.mxu1 %v4426_v40 }
 0x14b   :  { %3730 = vmatpush3.msra.mxu1 %v4426_v40 }
 0x14c   :  { %3731 = vmatprep.subr.mxu1 %v4430_v15 }
 0x14d   :  { %3732 = vmatpush3.msra.mxu1 %v4430_v15 }
 0x14e   :  { %3733 = vmatprep.subr.mxu1 %v4434_v47 }
 0x14f   :  { %3734 = vmatpush3.msra.mxu1 %v4434_v47 }
 0x150   :  { %3736 = vmatmul.mubr.msk.f32.vlgmr.msra.gmra.mxu1 %vm1375_vm1, %v3135_v27  ;;  %3757 = vmatprep.subr.mxu1 %v4402_v17  ;;  %v3187_v27 = vld [vmem:[%s4887_s3 + $0x1b8] sm:$0xff] }
 0x151   :  { %3758 = vmatpush3.msra.mxu1 %v4402_v17  ;;  %3773 = vmatprep.mubr.msk.f32.mxu1 %vm1375_vm1, %v3148_v51 }
 0x152   :  { %3759 = vmatprep.subr.mxu1 %v4405_v11 }
 0x153   :  { %3760 = vmatpush3.msra.mxu1 %v4405_v11 }
 0x154   :  { %3761 = vmatprep.subr.mxu1 %v4411_v19 }
 0x155   :  { %3762 = vmatpush3.msra.mxu1 %v4411_v19 }
 0x156   :  { %3763 = vmatprep.subr.mxu1 %v4416_v42 }
 0x157   :  { %3764 = vmatpush3.msra.mxu1 %v4416_v42 }
 0x158   :  { %3765 = vmatprep.subr.mxu1 %v4421_v10 }
 0x159   :  { %3766 = vmatpush3.msra.mxu1 %v4421_v10 }
 0x15a   :  { %3767 = vmatprep.subr.mxu1 %v4426_v40 }
 0x15b   :  { %3768 = vmatpush3.msra.mxu1 %v4426_v40 }
 0x15c   :  { %3769 = vmatprep.subr.mxu1 %v4430_v15 }
 0x15d   :  { %3770 = vmatpush3.msra.mxu1 %v4430_v15 }
 0x15e   :  { %3771 = vmatprep.subr.mxu1 %v4434_v47 }
 0x15f   :  { %3772 = vmatpush3.msra.mxu1 %v4434_v47 }
 0x160   :  { %3774 = vmatmul.mubr.msk.f32.vlgmr.msra.gmra.mxu1 %vm1375_vm1, %v3149_v32  ;;  %3795 = vmatprep.subr.mxu1 %v4402_v17  ;;  %v3186_v32 = vld [vmem:[%s4887_s3 + $0x1b0] sm:$0xff] }
 0x161   :  { %3796 = vmatpush3.msra.mxu1 %v4402_v17  ;;  %3811 = vmatprep.mubr.msk.f32.mxu1 %vm1375_vm1, %v3162_v36  ;;  %v3185_v36 = vld [vmem:[%s4887_s3 + $0x1a8] sm:$0xff] }
 0x162   :  { %3797 = vmatprep.subr.mxu1 %v4405_v11 }
 0x163   :  { %3798 = vmatpush3.msra.mxu1 %v4405_v11 }
 0x164   :  { %3799 = vmatprep.subr.mxu1 %v4411_v19 }
 0x165   :  { %3800 = vmatpush3.msra.mxu1 %v4411_v19 }
 0x166   :  { %3801 = vmatprep.subr.mxu1 %v4416_v42 }
 0x167   :  { %3802 = vmatpush3.msra.mxu1 %v4416_v42 }
 0x168   :  { %3803 = vmatprep.subr.mxu1 %v4421_v10 }
 0x169   :  { %3804 = vmatpush3.msra.mxu1 %v4421_v10 }
 0x16a   :  { %3805 = vmatprep.subr.mxu1 %v4426_v40 }
 0x16b   :  { %3806 = vmatpush3.msra.mxu1 %v4426_v40 }
 0x16c   :  { %3807 = vmatprep.subr.mxu1 %v4430_v15 }
 0x16d   :  { %3808 = vmatpush3.msra.mxu1 %v4430_v15 }
 0x16e   :  { %3809 = vmatprep.subr.mxu1 %v4434_v47 }
 0x16f   :  { %3810 = vmatpush3.msra.mxu1 %v4434_v47 }
 0x170   :  { %3812 = vmatmul.mubr.msk.f32.vlgmr.msra.gmra.mxu1 %vm1375_vm1, %v3163_v21  ;;  %3833 = vmatprep.subr.mxu1 %v4402_v17  ;;  %v3181_v21 = vld [vmem:[%s4887_s3 + $0x188] sm:$0xff] }
 0x171   :  { %3834 = vmatpush3.msra.mxu1 %v4402_v17  ;;  %3849 = vmatprep.mubr.msk.f32.mxu1 %vm1375_vm1, %v3176_v53  ;;  %v3180_v53 = vld [vmem:[%s4887_s3 + $0x180] sm:$0xff] }
 0x172   :  { %3835 = vmatprep.subr.mxu1 %v4405_v11 }
 0x173   :  { %3836 = vmatpush3.msra.mxu1 %v4405_v11 }
 0x174   :  { %3837 = vmatprep.subr.mxu1 %v4411_v19 }
 0x175   :  { %3838 = vmatpush3.msra.mxu1 %v4411_v19 }
 0x176   :  { %3839 = vmatprep.subr.mxu1 %v4416_v42 }
 0x177   :  { %3840 = vmatpush3.msra.mxu1 %v4416_v42 }
 0x178   :  { %3841 = vmatprep.subr.mxu1 %v4421_v10 }
 0x179   :  { %3842 = vmatpush3.msra.mxu1 %v4421_v10 }
 0x17a   :  { %3843 = vmatprep.subr.mxu1 %v4426_v40 }
 0x17b   :  { %3844 = vmatpush3.msra.mxu1 %v4426_v40 }
 0x17c   :  { %3845 = vmatprep.subr.mxu1 %v4430_v15 }
 0x17d   :  { %3846 = vmatpush3.msra.mxu1 %v4430_v15 }
 0x17e   :  { %3847 = vmatprep.subr.mxu1 %v4434_v47 }
 0x17f   :  { %3848 = vmatpush3.msra.mxu1 %v4434_v47 }
 0x180   :  { %3850 = vmatmul.mubr.msk.f32.vlgmr.msra.gmra.mxu1 %vm1375_vm1, %v3177_v54  ;;  %3871 = vmatprep.subr.mxu1 %v4402_v17 }
 0x181   :  { %3872 = vmatpush3.msra.mxu1 %v4402_v17  ;;  %3887 = vmatprep.mubr.msk.f32.mxu1 %vm1375_vm1, %v3190_v26  ;;  %v3201_v26 = vld [vmem:[%s4887_s3 + $0x1f8] sm:$0xff] }
 0x182   :  { %3873 = vmatprep.subr.mxu1 %v4405_v11 }
 0x183   :  { %3874 = vmatpush3.msra.mxu1 %v4405_v11 }
 0x184   :  { %3875 = vmatprep.subr.mxu1 %v4411_v19 }
 0x185   :  { %3876 = vmatpush3.msra.mxu1 %v4411_v19 }
 0x186   :  { %3877 = vmatprep.subr.mxu1 %v4416_v42 }
 0x187   :  { %3878 = vmatpush3.msra.mxu1 %v4416_v42 }
 0x188   :  { %3879 = vmatprep.subr.mxu1 %v4421_v10 }
 0x189   :  { %3880 = vmatpush3.msra.mxu1 %v4421_v10 }
 0x18a   :  { %3881 = vmatprep.subr.mxu1 %v4426_v40 }
 0x18b   :  { %3882 = vmatpush3.msra.mxu1 %v4426_v40 }
 0x18c   :  { %3883 = vmatprep.subr.mxu1 %v4430_v15 }
 0x18d   :  { %3884 = vmatpush3.msra.mxu1 %v4430_v15 }
 0x18e   :  { %3885 = vmatprep.subr.mxu1 %v4434_v47 }
 0x18f   :  { %3886 = vmatpush3.msra.mxu1 %v4434_v47 }
 0x190   :  { %3888 = vmatmul.mubr.msk.f32.vlgmr.msra.gmra.mxu1 %vm1375_vm1, %v3191_v50  ;;  %3909 = vmatprep.subr.mxu1 %v4402_v17 }
 0x191   :  { %3910 = vmatpush3.msra.mxu1 %v4402_v17  ;;  %3925 = vmatprep.mubr.msk.f32.mxu1 %vm1375_vm1, %v3204_v38  ;;  %v3125_v17 = vld [vmem:[%s4887_s3 + $0x88] sm:$0xff]  ;;  %v3200_v38 = vld [vmem:[%s4887_s3 + $0x1f0] sm:$0xff] }
 0x192   :  { %3911 = vmatprep.subr.mxu1 %v4405_v11 }
 0x193   :  { %3912 = vmatpush3.msra.mxu1 %v4405_v11  ;;  %v3143_v11 = vld [vmem:[%s4887_s3 + $0xe8] sm:$0xff] }
 0x194   :  { %3913 = vmatprep.subr.mxu1 %v4411_v19 }
 0x195   :  { %3914 = vmatpush3.msra.mxu1 %v4411_v19  ;;  %v3138_v19 = vld [vmem:[%s4887_s3 + $0xc0] sm:$0xff] }
 0x196   :  { %3915 = vmatprep.subr.mxu1 %v4416_v42 }
 0x197   :  { %3916 = vmatpush3.msra.mxu1 %v4416_v42 }
 0x198   :  { %3917 = vmatprep.subr.mxu1 %v4421_v10 }
 0x199   :  { %3918 = vmatpush3.msra.mxu1 %v4421_v10  ;;  %v3157_v10 = vld [vmem:[%s4887_s3 + $0x128] sm:$0xff] }
 0x19a   :  { %3919 = vmatprep.subr.mxu1 %v4426_v40 }
 0x19b   :  { %3920 = vmatpush3.msra.mxu1 %v4426_v40  ;;  %v3155_v40 = vld [vmem:[%s4887_s3 + $0x118] sm:$0xff] }
 0x19c   :  { %3921 = vmatprep.subr.mxu1 %v4430_v15 }
 0x19d   :  { %3922 = vmatpush3.msra.mxu1 %v4430_v15  ;;  %v3154_v15 = vld [vmem:[%s4887_s3 + $0x110] sm:$0xff] }
 0x19e   :  { %3923 = vmatprep.subr.mxu1 %v4434_v47 }
 0x19f   :  { %3924 = vmatpush3.msra.mxu1 %v4434_v47  ;;  %v3153_v47 = vld [vmem:[%s4887_s3 + $0x108] sm:$0xff] }
 0x1a0   :  { %3926 = vmatmul.mubr.msk.f32.vlgmr.msra.gmra.mxu1 %vm1375_vm1, %v3205_v56  ;;  %v3199_v56 = vld [vmem:[%s4887_s3 + $0x1e8] sm:$0xff] }
 0x1e0   :  { %v3623_v57 = vpop.f32.mrf.mxu1 }
 0x1e2   :  { %v1448_v23 = vpop.f32.mrf.mxu1 }
 0x1e3   :  { %3640 = vmatprep.mubr.msk.f32.mxu0 %vm1375_vm1, %v1448_v23  ;;  %v3197_v23 = vld [vmem:[%s4887_s3 + $0x1d8] sm:$0xff] }
 0x1e4   :  { %3641 = vmatmul.mubr.msk.f32.vlgmr.msra.gmra.mxu0 %vm1375_vm1, %v3623_v57  ;;  %v3198_v57 = vld [vmem:[%s4887_s3 + $0x1e0] sm:$0xff] }
 0x1e5   :  { %3663 = vmatpush3.msra.mxu0 %v4576_v8  ;;  %v3182_v8 = vld [vmem:[%s4887_s3 + $0x190] sm:$0xff] }
 0x1e6   :  { %3664 = vmatprep.subr.mxu0 %v3116_v58 }
 0x1e7   :  { %3665 = vmatpush3.msra.mxu0 %v3116_v58  ;;  %v3196_v58 = vld [vmem:[%s4887_s3 + $0x1d0] sm:$0xff] }
 0x1e8   :  { %3666 = vmatprep.subr.mxu0 %v3115_v28 }
 0x1e9   :  { %3667 = vmatpush3.msra.mxu0 %v3115_v28  ;;  %v3195_v28 = vld [vmem:[%s4887_s3 + $0x1c8] sm:$0xff] }
 0x1ea   :  { %3668 = vmatprep.subr.mxu0 %v3114_v59 }
 0x1eb   :  { %3669 = vmatpush3.msra.mxu0 %v3114_v59  ;;  %v3194_v59 = vld [vmem:[%s4887_s3 + $0x1c0] sm:$0xff] }
 0x1ec   :  { %3670 = vmatprep.subr.mxu0 %v3113_v61 }
 0x1ed   :  { %3671 = vmatpush3.msra.mxu0 %v3113_v61 }
 0x1ee   :  { %3672 = vmatprep.subr.mxu0 %v3112_v41 }
 0x1ef   :  { %3673 = vmatpush3.msra.mxu0 %v3112_v41  ;;  %v3215_v41 = vld [vmem:[%s4887_s3 + $0x238] sm:$0xff] }
 0x1f0   :  { %v3661_v1 = vpop.f32.mrf.mxu1  ;;  %3674 = vmatprep.subr.mxu0 %v3111_v49 }
 0x1f1   :  { %3675 = vmatpush3.msra.mxu0 %v3111_v49 }
 0x1f2   :  { %v1623_v22 = vpop.f32.mrf.mxu1  ;;  %3676 = vmatprep.subr.mxu0 %v3110_v60 }
 0x1f3   :  { %3677 = vmatpush3.msra.mxu0 %v3110_v60  ;;  %3678 = vmatprep.mubr.msk.f32.mxu0 %vm1375_vm1, %v1623_v22  ;;  %v3214_v60 = vld [vmem:[%s4887_s3 + $0x230] sm:$0xff]  ;;  %v3211_v22 = vld [vmem:[%s4887_s3 + $0x218] sm:$0xff] }
 0x1f4   :  { %3679 = vmatmul.mubr.msk.f32.vlgmr.msra.gmra.mxu0 %vm1375_vm1, %v3661_v1  ;;  %3700 = vmatprep.subr.mxu0 %v3131_v63  ;;  %v3213_v1 = vld [vmem:[%s4887_s3 + $0x228] sm:$0xff] }
 0x1f5   :  { %3701 = vmatpush3.msra.mxu0 %v3131_v63  ;;  %v3212_v63 = vld [vmem:[%s4887_s3 + $0x220] sm:$0xff] }
 0x1f6   :  { %3702 = vmatprep.subr.mxu0 %v3130_v3 }
 0x1f7   :  { %3703 = vmatpush3.msra.mxu0 %v3130_v3  ;;  %v3210_v3 = vld [vmem:[%s4887_s3 + $0x210] sm:$0xff] }
 0x1f8   :  { %3704 = vmatprep.subr.mxu0 %v3129_v44 }
 0x1f9   :  { %3705 = vmatpush3.msra.mxu0 %v3129_v44  ;;  %v3209_v44 = vld [vmem:[%s4887_s3 + $0x208] sm:$0xff] }
 0x1fa   :  { %3706 = vmatprep.subr.mxu0 %v3128_v13 }
 0x1fb   :  { %3707 = vmatpush3.msra.mxu0 %v3128_v13  ;;  %v3208_v13 = vld [vmem:[%s4887_s3 + $0x200] sm:$0xff] }
 0x1fc   :  { %3708 = vmatprep.subr.mxu0 %v3127_v55 }
 0x1fd   :  { %3709 = vmatpush3.msra.mxu0 %v3127_v55 }
 0x1fe   :  { %3710 = vmatprep.subr.mxu0 %v3126_v37 }
 0x1ff   :  { %3711 = vmatpush3.msra.mxu0 %v3126_v37 }
 0x200   :  { %v3699_v4 = vpop.f32.mrf.mxu1  ;;  %3712 = vmatprep.subr.mxu0 %v3125_v17 }
 0x201   :  { %3713 = vmatpush3.msra.mxu0 %v3125_v17 }
 0x202   :  { %v1799_v14 = vpop.f32.mrf.mxu1  ;;  %3714 = vmatprep.subr.mxu0 %v3124_v2 }
 0x203   :  { %3715 = vmatpush3.msra.mxu0 %v3124_v2  ;;  %3716 = vmatprep.mubr.msk.f32.mxu0 %vm1375_vm1, %v1799_v14 }
 0x204   :  { %3717 = vmatmul.mubr.msk.f32.vlgmr.msra.gmra.mxu0 %vm1375_vm1, %v3699_v4  ;;  %3738 = vmatprep.subr.mxu0 %v3145_v9 }
 0x205   :  { %3739 = vmatpush3.msra.mxu0 %v3145_v9 }
 0x206   :  { %3740 = vmatprep.subr.mxu0 %v3144_v18 }
 0x207   :  { %3741 = vmatpush3.msra.mxu0 %v3144_v18 }
 0x208   :  { %3742 = vmatprep.subr.mxu0 %v3143_v11 }
 0x209   :  { %3743 = vmatpush3.msra.mxu0 %v3143_v11 }
 0x20a   :  { %3744 = vmatprep.subr.mxu0 %v3142_v16 }
 0x20b   :  { %3745 = vmatpush3.msra.mxu0 %v3142_v16 }
 0x20c   :  { %3746 = vmatprep.subr.mxu0 %v3141_v20 }
 0x20d   :  { %3747 = vmatpush3.msra.mxu0 %v3141_v20 }
 0x20e   :  { %3748 = vmatprep.subr.mxu0 %v3140_v29 }
 0x20f   :  { %3749 = vmatpush3.msra.mxu0 %v3140_v29 }
 0x210   :  { %v3737_v0 = vpop.f32.mrf.mxu1  ;;  %3750 = vmatprep.subr.mxu0 %v3139_v33 }
 0x211   :  { %3751 = vmatpush3.msra.mxu0 %v3139_v33  ;;  %v3101_v33 = vld [vmem:[%s4888_s4] ss:$0 sm:$0xff] }
 0x212   :  { %v1975_v42 = vpop.f32.mrf.mxu1  ;;  %3752 = vmatprep.subr.mxu0 %v3138_v19 }
 0x213   :  { %3753 = vmatpush3.msra.mxu0 %v3138_v19  ;;  %3754 = vmatprep.mubr.msk.f32.mxu0 %vm1375_vm1, %v1975_v42 }
 0x214   :  { %3755 = vmatmul.mubr.msk.f32.vlgmr.msra.gmra.mxu0 %vm1375_vm1, %v3737_v0  ;;  %3776 = vmatprep.subr.mxu0 %v3159_v5 }
 0x215   :  { %3777 = vmatpush3.msra.mxu0 %v3159_v5 }
 0x216   :  { %3778 = vmatprep.subr.mxu0 %v3158_v43 }
 0x217   :  { %3779 = vmatpush3.msra.mxu0 %v3158_v43 }
 0x218   :  { %3780 = vmatprep.subr.mxu0 %v3157_v10 }
 0x219   :  { %3781 = vmatpush3.msra.mxu0 %v3157_v10 }
 0x21a   :  { %3782 = vmatprep.subr.mxu0 %v3156_v24 }
 0x21b   :  { %3783 = vmatpush3.msra.mxu0 %v3156_v24 }
 0x21c   :  { %3784 = vmatprep.subr.mxu0 %v3155_v40 }
 0x21d   :  { %3785 = vmatpush3.msra.mxu0 %v3155_v40 }
 0x21e   :  { %3786 = vmatprep.subr.mxu0 %v3154_v15 }
 0x21f   :  { %3787 = vmatpush3.msra.mxu0 %v3154_v15 }
 0x220   :  { %v3775_v31 = vpop.f32.mrf.mxu1  ;;  %3788 = vmatprep.subr.mxu0 %v3153_v47 }
 0x221   :  { %3789 = vmatpush3.msra.mxu0 %v3153_v47 }
 0x222   :  { %v2151_v39 = vpop.f32.mrf.mxu1  ;;  %3790 = vmatprep.subr.mxu0 %v3152_v62 }
 0x223   :  { %3791 = vmatpush3.msra.mxu0 %v3152_v62  ;;  %3792 = vmatprep.mubr.msk.f32.mxu0 %vm1375_vm1, %v2151_v39 }
 0x224   :  { %3793 = vmatmul.mubr.msk.f32.vlgmr.msra.gmra.mxu0 %vm1375_vm1, %v3775_v31  ;;  %3814 = vmatprep.subr.mxu0 %v3173_v35 }
 0x225   :  { %3815 = vmatpush3.msra.mxu0 %v3173_v35 }
 0x226   :  { %3816 = vmatprep.subr.mxu0 %v3172_v45 }
 0x227   :  { %3817 = vmatpush3.msra.mxu0 %v3172_v45 }
 0x228   :  { %3818 = vmatprep.subr.mxu0 %v3171_v7 }
 0x229   :  { %3819 = vmatpush3.msra.mxu0 %v3171_v7 }
 0x22a   :  { %3820 = vmatprep.subr.mxu0 %v3170_v12 }
 0x22b   :  { %3821 = vmatpush3.msra.mxu0 %v3170_v12 }
 0x22c   :  { %3822 = vmatprep.subr.mxu0 %v3169_v25 }
 0x22d   :  { %3823 = vmatpush3.msra.mxu0 %v3169_v25 }
 0x22e   :  { %3824 = vmatprep.subr.mxu0 %v3168_v30 }
 0x22f   :  { %3825 = vmatpush3.msra.mxu0 %v3168_v30 }
 0x230   :  { %v3813_v6 = vpop.f32.mrf.mxu1  ;;  %3826 = vmatprep.subr.mxu0 %v3167_v34 }
 0x231   :  { %3827 = vmatpush3.msra.mxu0 %v3167_v34 }
 0x232   :  { %v2327_v51 = vpop.f32.mrf.mxu1  ;;  %3828 = vmatprep.subr.mxu0 %v3166_v48 }
 0x233   :  { %3829 = vmatpush3.msra.mxu0 %v3166_v48  ;;  %3830 = vmatprep.mubr.msk.f32.mxu0 %vm1375_vm1, %v2327_v51 }
 0x234   :  { %3831 = vmatmul.mubr.msk.f32.vlgmr.msra.gmra.mxu0 %vm1375_vm1, %v3813_v6  ;;  %3852 = vmatprep.subr.mxu0 %v3187_v27 }
 0x235   :  { %3853 = vmatpush3.msra.mxu0 %v3187_v27 }
 0x236   :  { %3854 = vmatprep.subr.mxu0 %v3186_v32 }
 0x237   :  { %3855 = vmatpush3.msra.mxu0 %v3186_v32 }
 0x238   :  { %3856 = vmatprep.subr.mxu0 %v3185_v36 }
 0x239   :  { %3857 = vmatpush3.msra.mxu0 %v3185_v36 }
 0x23a   :  { %3858 = vmatprep.subr.mxu0 %v3184_v46 }
 0x23b   :  { %3859 = vmatpush3.msra.mxu0 %v3184_v46 }
 0x23c   :  { %3860 = vmatprep.subr.mxu0 %v3183_v52 }
 0x23d   :  { %3861 = vmatpush3.msra.mxu0 %v3183_v52 }
 0x23e   :  { %3862 = vmatprep.subr.mxu0 %v3182_v8 }
 0x23f   :  { %3863 = vmatpush3.msra.mxu0 %v3182_v8 }
 0x240   :  { %v3851_v54 = vpop.f32.mrf.mxu1  ;;  %3864 = vmatprep.subr.mxu0 %v3181_v21 }
 0x241   :  { %3865 = vmatpush3.msra.mxu0 %v3181_v21 }
 0x242   :  { %v2503_v50 = vpop.f32.mrf.mxu1  ;;  %3866 = vmatprep.subr.mxu0 %v3180_v53 }
 0x243   :  { %3867 = vmatpush3.msra.mxu0 %v3180_v53  ;;  %3868 = vmatprep.mubr.msk.f32.mxu0 %vm1375_vm1, %v2503_v50 }
 0x244   :  { %3869 = vmatmul.mubr.msk.f32.vlgmr.msra.gmra.mxu0 %vm1375_vm1, %v3851_v54  ;;  %3890 = vmatprep.subr.mxu0 %v3201_v26 }
 0x245   :  { %3891 = vmatpush3.msra.mxu0 %v3201_v26 }
 0x246   :  { %3892 = vmatprep.subr.mxu0 %v3200_v38 }
 0x247   :  { %3893 = vmatpush3.msra.mxu0 %v3200_v38 }
 0x248   :  { %3894 = vmatprep.subr.mxu0 %v3199_v56 }
 0x249   :  { %3895 = vmatpush3.msra.mxu0 %v3199_v56 }
 0x24a   :  { %3896 = vmatprep.subr.mxu0 %v3198_v57 }
 0x24b   :  { %3897 = vmatpush3.msra.mxu0 %v3198_v57 }
 0x24c   :  { %3898 = vmatprep.subr.mxu0 %v3197_v23 }
 0x24d   :  { %3899 = vmatpush3.msra.mxu0 %v3197_v23 }
 0x24e   :  { %3900 = vmatprep.subr.mxu0 %v3196_v58 }
 0x24f   :  { %3901 = vmatpush3.msra.mxu0 %v3196_v58 }
 0x250   :  { %v3889_v61 = vpop.f32.mrf.mxu1  ;;  %3902 = vmatprep.subr.mxu0 %v3195_v28 }
 0x251   :  { %3903 = vmatpush3.msra.mxu0 %v3195_v28 }
 0x252   :  { %v2679_v49 = vpop.f32.mrf.mxu1  ;;  %3904 = vmatprep.subr.mxu0 %v3194_v59 }
 0x253   :  { %3905 = vmatpush3.msra.mxu0 %v3194_v59  ;;  %3906 = vmatprep.mubr.msk.f32.mxu0 %vm1375_vm1, %v2679_v49 }
 0x254   :  { %3907 = vmatmul.mubr.msk.f32.vlgmr.msra.gmra.mxu0 %vm1375_vm1, %v3889_v61  ;;  %3928 = vmatprep.subr.mxu0 %v3215_v41 }
 0x255   :  { %3929 = vmatpush3.msra.mxu0 %v3215_v41 }
 0x256   :  { %3930 = vmatprep.subr.mxu0 %v3214_v60 }
 0x257   :  { %3931 = vmatpush3.msra.mxu0 %v3214_v60 }
 0x258   :  { %3932 = vmatprep.subr.mxu0 %v3213_v1 }
 0x259   :  { %3933 = vmatpush3.msra.mxu0 %v3213_v1 }
 0x25a   :  { %3934 = vmatprep.subr.mxu0 %v3212_v63 }
 0x25b   :  { %3935 = vmatpush3.msra.mxu0 %v3212_v63 }
 0x25c   :  { %3936 = vmatprep.subr.mxu0 %v3211_v22 }
 0x25d   :  { %3937 = vmatpush3.msra.mxu0 %v3211_v22 }
 0x25e   :  { %3938 = vmatprep.subr.mxu0 %v3210_v3 }
 0x25f   :  { %3939 = vmatpush3.msra.mxu0 %v3210_v3 }
 0x260   :  { %v3927_v55 = vpop.f32.mrf.mxu1  ;;  %3940 = vmatprep.subr.mxu0 %v3209_v44 }
 0x261   :  { %3941 = vmatpush3.msra.mxu0 %v3209_v44 }
 0x262   :  { %v2855_v37 = vpop.f32.mrf.mxu1  ;;  %3942 = vmatprep.subr.mxu0 %v3208_v13 }
 0x263   :  { %3943 = vmatpush3.msra.mxu0 %v3208_v13  ;;  %3944 = vmatprep.mubr.msk.f32.mxu0 %vm1375_vm1, %v2855_v37 }
 0x264   :  { %3945 = vmatmul.mubr.msk.f32.vlgmr.msra.gmra.mxu0 %vm1375_vm1, %v3927_v55 }
 0x2a4   :  { %v3642_v17 = vpop.f32.mrf.mxu0 }
 0x2a5   :  { %v1547_v0 = vadd.f32 %v3642_v17, %v3101_v33 }
 0x2a6   :  { %v1537_v2 = vpop.f32.mrf.mxu0 }
 0x2a7   :  { %v1546_v42 = vadd.f32 %v3101_v33, %v1537_v2 }
 0x2b4   :  { %v3680_v4 = vpop.f32.mrf.mxu0 }
 0x2b5   :  { %v1723_v43 = vadd.f32 %v3680_v4, %v1547_v0 }
 0x2b6   :  { %v1713_v9 = vpop.f32.mrf.mxu0 }
 0x2b7   :  { %v1722_v24 = vadd.f32 %v1713_v9, %v1546_v42 }
 0x2c4   :  { %v3718_v14 = vpop.f32.mrf.mxu0 }
 0x2c5   :  { %v1899_v40 = vadd.f32 %v3718_v14, %v1723_v43 }
 0x2c6   :  { %v1889_v18 = vpop.f32.mrf.mxu0 }
 0x2c7   :  { %v1898_v15 = vadd.f32 %v1889_v18, %v1722_v24 }
 0x2d4   :  { %v3756_v11 = vpop.f32.mrf.mxu0 }
 0x2d5   :  { %v2075_v47 = vadd.f32 %v3756_v11, %v1899_v40 }
 0x2d6   :  { %v2065_v16 = vpop.f32.mrf.mxu0 }
 0x2d7   :  { %v2074_v31 = vadd.f32 %v2065_v16, %v1898_v15 }
 0x2e4   :  { %v3794_v20 = vpop.f32.mrf.mxu0 }
 0x2e5   :  { %v2251_v35 = vadd.f32 %v3794_v20, %v2075_v47 }
 0x2e6   :  { %v2241_v29 = vpop.f32.mrf.mxu0 }
 0x2e7   :  { %v2250_v45 = vadd.f32 %v2241_v29, %v2074_v31 }
 0x2f4   :  { %v3832_v19 = vpop.f32.mrf.mxu0 }
 0x2f5   :  { %v2427_v7 = vadd.f32 %v3832_v19, %v2251_v35 }
 0x2f6   :  { %v2417_v5 = vpop.f32.mrf.mxu0 }
 0x2f7   :  { %v2426_v12 = vadd.f32 %v2417_v5, %v2250_v45 }
 0x304   :  { %v3870_v10 = vpop.f32.mrf.mxu0 }
 0x305   :  { %v2603_v25 = vadd.f32 %v3870_v10, %v2427_v7 }
 0x306   :  { %v2593_v62 = vpop.f32.mrf.mxu0 }
 0x307   :  { %v2602_v34 = vadd.f32 %v2593_v62, %v2426_v12 }
 0x314   :  { %v3908_v39 = vpop.f32.mrf.mxu0 }
 0x315   :  { %v2779_v48 = vadd.f32 %v3908_v39, %v2603_v25 }
 0x316   :  { %v2769_v30 = vpop.f32.mrf.mxu0 }
 0x317   :  { %v2778_v27 = vadd.f32 %v2769_v30, %v2602_v34 }
 0x324   :  { %v3946_v6 = vpop.f32.mrf.mxu0 }
 0x325   :  { %v2955_v51 = vadd.f32 %v3946_v6, %v2779_v48 }
 0x326   :  { %v2945_v32 = vpop.f32.mrf.mxu0 }
 0x327   :  { %v2957_v36 = vmax.f32 %v2955_v51, 0.0  ;;  %v2954_v46 = vadd.f32 %v2945_v32, %v2778_v27 }
 0x329   :  { %2959 = vst [vmem:[%s4889_s6 + $0x8] sm:$0xff] %v2957_v36  ;;  %v2956_v52 = vmax.f32 %v2954_v46, 0.0 }
 0x32b   :  { %2958 = vst [vmem:[%s4889_s6] sm:$0xff] %v2956_v52 }

</bundles_post_ra>
